<compile_context>
chip_gen: v7x
topology: tpu7x:2x2x1
jax: 0.10.0
libtpu: 0.0.40
codegen_flags: <defaults>
</compile_context>

<pallas_src>
import functools

import jax
import jax.numpy as jnp
from jax.experimental import pallas as pl
from jax.experimental.pallas import tpu as pltpu

_NEG_INF = -1e30  # finite "minus infinity" for padded class lanes


def _round_up(n: int, m: int) -> int:
    return (n + m - 1) // m * m


def _log_softmax_store(logits, out_ref):
    # Padded class lanes carry a -1e30 bias -> exp underflows to exactly 0, so the
    # padded logsumexp equals the unpadded one.  All math here is f32.
    m = jnp.max(logits, axis=-1, keepdims=True)
    z = logits - m
    lse = jnp.log(jnp.sum(jnp.exp(z), axis=-1, keepdims=True))
    out_ref[...] = (z - lse).astype(out_ref.dtype)


def _transform_kernel(x_ref, wt_ref, bt_ref, w_ref, b_ref, out_ref):
    # x:(TB,Dp) wt:(Dp,Dp) bt:(1,Dp) w:(Dp,Cp) b:(1,Cp) out:(TB,Cp)
    h = jnp.dot(x_ref[...], wt_ref[...], preferred_element_type=jnp.float32)
    h = jnp.maximum(h + bt_ref[...], 0.0)                 # f32 bias-add + ReLU
    logits = jnp.dot(h.astype(w_ref.dtype), w_ref[...],
                     preferred_element_type=jnp.float32) + b_ref[...]
    _log_softmax_store(logits, out_ref)


def _plain_kernel(x_ref, w_ref, b_ref, out_ref):
    # transform=False: no lin_t, no ReLU.
    logits = jnp.dot(x_ref[...], w_ref[...],
                     preferred_element_type=jnp.float32) + b_ref[...]
    _log_softmax_store(logits, out_ref)


@functools.partial(jax.jit, static_argnames=("transform", "block_b", "compute_dtype"))
def sensenet_forward(x, w_t, b_t, w, b, *, transform=True, block_b=256,
                     compute_dtype=jnp.bfloat16):
    """x: (B, D) float32.  Weights stored (in, out).  Returns (B, C) f32 log-probs."""
    B, D = x.shape
    C = w.shape[1]
    Dp = _round_up(D, 128)                 # lane-dense feature / MXU-K dim
    Cp = _round_up(C, 128)                 # lane-dense class dim
    TB = min(block_b, _round_up(B, 8))     # batch tile (multiple of 8 sublanes)
    Bp = _round_up(B, TB)

    f32 = jnp.float32
    # Zero-pad inputs/weights; pad class lanes get a -1e30 bias.
    xp = jnp.zeros((Bp, Dp), compute_dtype).at[:B, :D].set(x.astype(compute_dtype))
    wp = jnp.zeros((Dp, Cp), compute_dtype).at[:D, :C].set(w.astype(compute_dtype))
    bp = jnp.full((1, Cp), _NEG_INF, f32).at[:, :C].set(b.astype(f32).reshape(1, C))

    row_spec = lambda shape: pl.BlockSpec(shape, lambda i: (i, 0))   # tiled over batch
    rep_spec = lambda shape: pl.BlockSpec(shape, lambda i: (0, 0))   # VMEM-resident

    if transform:
        wtp = jnp.zeros((Dp, Dp), compute_dtype).at[:D, :D].set(w_t.astype(compute_dtype))
        btp = jnp.zeros((1, Dp), f32).at[:, :D].set(b_t.astype(f32).reshape(1, D))
        kernel = _transform_kernel
        operands = (xp, wtp, btp, wp, bp)
        in_specs = [row_spec((TB, Dp)), rep_spec((Dp, Dp)), rep_spec((1, Dp)),
                    rep_spec((Dp, Cp)), rep_spec((1, Cp))]
        flops = 2 * Bp * Dp * Dp + 2 * Bp * Dp * Cp
    else:
        kernel = _plain_kernel
        operands = (xp, wp, bp)
        in_specs = [row_spec((TB, Dp)), rep_spec((Dp, Cp)), rep_spec((1, Cp))]
        flops = 2 * Bp * Dp * Cp

    nbytes = lambda a: a.size * a.dtype.itemsize
    cost = pl.CostEstimate(
        flops=flops,
        transcendentals=Bp * Cp + Bp,
        bytes_accessed=sum(nbytes(a) for a in operands) + Bp * Cp * 4,
    )

    out_padded = pl.pallas_call(
        kernel,
        out_shape=jax.ShapeDtypeStruct((Bp, Cp), f32),
        grid=(Bp // TB,),
        in_specs=in_specs,
        out_specs=row_spec((TB, Cp)),
        compiler_params=pltpu.CompilerParams(
            dimension_semantics=("parallel",)),
        cost_estimate=cost,
    )(*operands)
    return out_padded[:B, :C]


def _reference(x, w_t, b_t, w, b, *, transform, compute_dtype=jnp.bfloat16):
    """Pure-JAX reference with matching compute dtypes (bf16 operands, f32 accum)."""
    f32 = jnp.float32
    xc = x.astype(compute_dtype)
    if transform:
        h = jnp.dot(xc, w_t.astype(compute_dtype), preferred_element_type=f32)
        h = jnp.maximum(h + b_t.astype(f32).reshape(1, -1), 0.0)
        hc = h.astype(compute_dtype)
    else:
        hc = xc
    logits = jnp.dot(hc, w.astype(compute_dtype), preferred_element_type=f32)
    logits = logits + b.astype(f32).reshape(1, -1)
    return jax.nn.log_softmax(logits, axis=-1)


if __name__ == "__main__":
    # Module defaults: input_dim=600 (concatenated bilstm hidden states), 41 classes.
    B, D, C = 64, 600, 41

    key = jax.random.PRNGKey(0)
    kx, k1, k2, k3, k4 = jax.random.split(key, 5)
    x = jax.random.normal(kx, (B, D), jnp.float32)

    # torch.nn.Linear-style U(-1/sqrt(fan_in), 1/sqrt(fan_in)) init.
    bound = 1.0 / (D ** 0.5)
    w_t = jax.random.uniform(k1, (D, D), jnp.float32, -bound, bound)
    b_t = jax.random.uniform(k2, (1, D), jnp.float32, -bound, bound)
    w = jax.random.uniform(k3, (D, C), jnp.float32, -bound, bound)
    b = jax.random.uniform(k4, (1, C), jnp.float32, -bound, bound)

    # transform=True path (lin_t + ReLU + lin + log_softmax)
    out = jax.block_until_ready(sensenet_forward(x, w_t, b_t, w, b, transform=True))
    assert out.shape == (B, C)
    ref = _reference(x, w_t, b_t, w, b, transform=True)
    assert jnp.allclose(out, ref, atol=2e-3, rtol=2e-3), "mismatch (transform=True)"
    # Output rows must be normalized log-probabilities.
    assert jnp.allclose(jax.scipy.special.logsumexp(out, axis=-1),
                        jnp.zeros((B,), jnp.float32), atol=1e-3), "not normalized"

    # transform=False path (lin + log_softmax only, specialized kernel)
    out_nt = jax.block_until_ready(sensenet_forward(x, w_t, b_t, w, b, transform=False))
    ref_nt = _reference(x, w_t, b_t, w, b, transform=False)
    assert jnp.allclose(out_nt, ref_nt, atol=2e-3, rtol=2e-3), "mismatch (transform=False)"

    print("KERNEL_OK")
</pallas_src>

<mosaic_0001>
module attributes {stable_mosaic.version = 11 : i64} {
  func.func @_transform_kernel(%arg0: i32, %arg1: memref<64x640xbf16, #tpu.memory_space<vmem>>, %arg2: memref<640x640xbf16, #tpu.memory_space<vmem>>, %arg3: memref<1x640xf32, #tpu.memory_space<vmem>>, %arg4: memref<640x128xbf16, #tpu.memory_space<vmem>>, %arg5: memref<1x128xf32, #tpu.memory_space<vmem>>, %arg6: memref<64x128xf32, #tpu.memory_space<vmem>>) attributes {dimension_semantics = [#tpu.dimension_semantics<parallel>], iteration_bounds = array<i64: 1>, scalar_prefetch = 0 : i64, scratch_operands = 0 : i64, tpu.core_type = #tpu.core_type<tc>, window_params = [{transform_indices = @transform_0, window_bounds = array<i64: 64, 640>}, {pipeline_mode = #tpu.pipeline_mode<synchronous>, transform_indices = @transform_1, window_bounds = array<i64: 640, 640>}, {pipeline_mode = #tpu.pipeline_mode<synchronous>, transform_indices = @transform_2, window_bounds = array<i64: 1, 640>}, {pipeline_mode = #tpu.pipeline_mode<synchronous>, transform_indices = @transform_3, window_bounds = array<i64: 640, 128>}, {pipeline_mode = #tpu.pipeline_mode<synchronous>, transform_indices = @transform_4, window_bounds = array<i64: 1, 128>}, {transform_indices = @transform_5, window_bounds = array<i64: 64, 128>}]} {
    %c0 = arith.constant 0 : index
    %c0_0 = arith.constant 0 : index
    %0 = vector.load %arg1[%c0, %c0_0] : memref<64x640xbf16, #tpu.memory_space<vmem>>, vector<64x640xbf16>
    %c0_1 = arith.constant 0 : index
    %c0_2 = arith.constant 0 : index
    %1 = vector.load %arg2[%c0_1, %c0_2] : memref<640x640xbf16, #tpu.memory_space<vmem>>, vector<640x640xbf16>
    %cst = arith.constant dense<0.000000e+00> : vector<64x640xf32>
    %2 = tpu.matmul %0, %1, %cst {dimension_numbers = #tpu.dot_dimension_numbers<[1], [0], [0], [1], [0, 0, 1, 1], [], []>} : vector<64x640xbf16>, vector<640x640xbf16>, vector<64x640xf32> -> vector<64x640xf32>
    %c0_3 = arith.constant 0 : index
    %c0_4 = arith.constant 0 : index
    %3 = vector.load %arg3[%c0_3, %c0_4] : memref<1x640xf32, #tpu.memory_space<vmem>>, vector<1x640xf32>
    %4 = vector.broadcast %3 : vector<1x640xf32> to vector<64x640xf32>
    %5 = arith.addf %2, %4 : vector<64x640xf32>
    %cst_5 = arith.constant 0.000000e+00 : f32
    %6 = vector.broadcast %cst_5 : f32 to vector<64x640xf32>
    %7 = arith.maximumf %5, %6 : vector<64x640xf32>
    %8 = arith.truncf %7 : vector<64x640xf32> to vector<64x640xbf16>
    %c0_6 = arith.constant 0 : index
    %c0_7 = arith.constant 0 : index
    %9 = vector.load %arg4[%c0_6, %c0_7] : memref<640x128xbf16, #tpu.memory_space<vmem>>, vector<640x128xbf16>
    %cst_8 = arith.constant dense<0.000000e+00> : vector<64x128xf32>
    %10 = tpu.matmul %8, %9, %cst_8 {dimension_numbers = #tpu.dot_dimension_numbers<[1], [0], [0], [1], [0, 0, 1, 1], [], []>} : vector<64x640xbf16>, vector<640x128xbf16>, vector<64x128xf32> -> vector<64x128xf32>
    %c0_9 = arith.constant 0 : index
    %c0_10 = arith.constant 0 : index
    %11 = vector.load %arg5[%c0_9, %c0_10] : memref<1x128xf32, #tpu.memory_space<vmem>>, vector<1x128xf32>
    %12 = vector.broadcast %11 : vector<1x128xf32> to vector<64x128xf32>
    %13 = arith.addf %10, %12 : vector<64x128xf32>
    %cst_11 = arith.constant dense<0xFF800000> : vector<64xf32>
    %14 = vector.multi_reduction <maximumf>, %13, %cst_11 [1] : vector<64x128xf32> to vector<64xf32>
    %15 = vector.shape_cast %14 : vector<64xf32> to vector<64x1xf32>
    %16 = vector.broadcast %15 : vector<64x1xf32> to vector<64x128xf32>
    %17 = arith.subf %13, %16 : vector<64x128xf32>
    %18 = math.exp %17 : vector<64x128xf32>
    %cst_12 = arith.constant dense<0.000000e+00> : vector<64xf32>
    %19 = vector.multi_reduction <add>, %18, %cst_12 [1] : vector<64x128xf32> to vector<64xf32>
    %20 = vector.shape_cast %19 : vector<64xf32> to vector<64x1xf32>
    %21 = math.log %20 : vector<64x1xf32>
    %22 = vector.broadcast %21 : vector<64x1xf32> to vector<64x128xf32>
    %23 = arith.subf %17, %22 : vector<64x128xf32>
    %c0_13 = arith.constant 0 : index
    %c0_14 = arith.constant 0 : index
    %24 = vector.load %arg6[%c0_13, %c0_14] : memref<64x128xf32, #tpu.memory_space<vmem>>, vector<64x128xf32>
    tpu.vector_store %arg6[%c0_13, %c0_14], %23 {strides = array<i32>} : memref<64x128xf32, #tpu.memory_space<vmem>>, vector<64x128xf32>,
    return
  }
  func.func @transform_0(%arg0: i32) -> (i32, i32) {
    %c0_i32 = arith.constant 0 : i32
    %c0_i32_0 = arith.constant 0 : i32
    return %arg0, %c0_i32 : i32, i32
  }
  func.func @transform_1(%arg0: i32) -> (i32, i32) {
    %c0_i32 = arith.constant 0 : i32
    %c0_i32_0 = arith.constant 0 : i32
    %c0_i32_1 = arith.constant 0 : i32
    return %c0_i32, %c0_i32_0 : i32, i32
  }
  func.func @transform_2(%arg0: i32) -> (i32, i32) {
    %c0_i32 = arith.constant 0 : i32
    %c0_i32_0 = arith.constant 0 : i32
    %c0_i32_1 = arith.constant 0 : i32
    return %c0_i32, %c0_i32_0 : i32, i32
  }
  func.func @transform_3(%arg0: i32) -> (i32, i32) {
    %c0_i32 = arith.constant 0 : i32
    %c0_i32_0 = arith.constant 0 : i32
    %c0_i32_1 = arith.constant 0 : i32
    return %c0_i32, %c0_i32_0 : i32, i32
  }
  func.func @transform_4(%arg0: i32) -> (i32, i32) {
    %c0_i32 = arith.constant 0 : i32
    %c0_i32_0 = arith.constant 0 : i32
    %c0_i32_1 = arith.constant 0 : i32
    return %c0_i32, %c0_i32_0 : i32, i32
  }
  func.func @transform_5(%arg0: i32) -> (i32, i32) {
    %c0_i32 = arith.constant 0 : i32
    %c0_i32_0 = arith.constant 0 : i32
    return %arg0, %c0_i32 : i32, i32
  }
}

</mosaic_0001>

<bundles_post_ra>
// kernel: sensenet_forward.1
= control target key start
LH: loop header
LB: loop body
LE: loop exit
PB: predicated region body
PF: predicated region fallthrough
CT: control target
= control target key end

     0   :  { %s4774_s1 = inlined_call_operand.vmem [shape: bf16[640,640], index: 1, kind: input, shape index: {}]   ;;  %s4775_s0 = inlined_call_operand.vmem [shape: bf16[64,640], index: 0, kind: input, shape index: {}]   ;;  %s4776_s3 = inlined_call_operand.vmem [shape: bf16[640,128], index: 3, kind: input, shape index: {}]   ;;  %s4777_s2 = inlined_call_operand.vmem [shape: f32[1,640], index: 2, kind: input, shape index: {}]   ;;  %s4778_s4 = inlined_call_operand.vmem [shape: f32[1,128], index: 4, kind: input, shape index: {}]   ;;  %s4779_s5 = inlined_call_operand.vmem [shape: f32[64,128], index: 5, kind: output, shape index: {}]  }
   0x1   :  { %v3353_v0 = vld [vmem:[%s4774_s1 + $0x4] ss:$20 sps:$4 sm:$0xff]   ;;  %v3355_v1 = vld [vmem:[%s4774_s1 + $0xc] ss:$20 sps:$4 sm:$0xff]   ;;  %v3358_v3 = vld [vmem:[%s4774_s1 + $0x8] ss:$20 sps:$4 sm:$0xff]  }
   0x2   :  { %1456 = vmatprep.subr.bf16.mxu0 %v3353_v0  ;;  %v3357_v2 = vld [vmem:[%s4774_s1] ss:$20 sps:$4 sm:$0xff]   ;;  %1675 = vmatprep.subr.bf16.mxu1 %v3355_v1  ;;  %v3363_v6 = vld [vmem:[%s4774_s1 + $0x28] ss:$20 sps:$4 sm:$0xff]   ;;  %v3364_v7 = vld [vmem:[%s4774_s1 + $0x30] ss:$20 sps:$4 sm:$0xff]  }
   0x3   :  { %v3359_v4 = vld [vmem:[%s4774_s1 + $0x2c] ss:$20 sps:$4 sm:$0xff]   ;;  %1457 = vmatpush1.bf16.msra.mxu0 %v3357_v2  ;;  %1676 = vmatpush1.bf16.msra.mxu1 %v3358_v3  ;;  %v3361_v5 = vld [vmem:[%s4774_s1 + $0x34] ss:$20 sps:$4 sm:$0xff]   ;;  %v3367_v9 = vld [vmem:[%s4774_s1 + $0x5c] ss:$20 sps:$4 sm:$0xff]  }
   0x4   :  { %1458 = vmatprep.subr.bf16.mxu0 %v3359_v4  ;;  %1677 = vmatprep.subr.bf16.mxu1 %v3361_v5  ;;  %v3365_v8 = vld [vmem:[%s4774_s1 + $0x54] ss:$20 sps:$4 sm:$0xff]   ;;  %v3369_v10 = vld [vmem:[%s4774_s1 + $0x50] ss:$20 sps:$4 sm:$0xff]   ;;  %v3370_v11 = vld [vmem:[%s4774_s1 + $0x58] ss:$20 sps:$4 sm:$0xff]  }
   0x5   :  { %v3371_v12 = vld [vmem:[%s4774_s1 + $0x7c] ss:$20 sps:$4 sm:$0xff]   ;;  %v3373_v13 = vld [vmem:[%s4774_s1 + $0x84] ss:$20 sps:$4 sm:$0xff]   ;;  %v3376_v15 = vld [vmem:[%s4774_s1 + $0x80] ss:$20 sps:$4 sm:$0xff]  }
   0x6   :  { %v3375_v14 = vld [vmem:[%s4774_s1 + $0x78] ss:$20 sps:$4 sm:$0xff]   ;;  %v3381_v18 = vld [vmem:[%s4774_s1 + $0xa0] ss:$20 sps:$4 sm:$0xff]   ;;  %v3382_v19 = vld [vmem:[%s4774_s1 + $0xa8] ss:$20 sps:$4 sm:$0xff]  }
   0x7   :  { %1459 = vmatpush1.bf16.msra.mxu0 %v3363_v6  ;;  %1678 = vmatpush1.bf16.msra.mxu1 %v3364_v7  ;;  %v3377_v16 = vld [vmem:[%s4774_s1 + $0xa4] ss:$20 sps:$4 sm:$0xff]   ;;  %v3379_v17 = vld [vmem:[%s4774_s1 + $0xac] ss:$20 sps:$4 sm:$0xff]   ;;  %v3385_v21 = vld [vmem:[%s4774_s1 + $0xd4] ss:$20 sps:$4 sm:$0xff]  }
   0x8   :  { %1460 = vmatprep.subr.bf16.mxu0 %v3365_v8  ;;  %1679 = vmatprep.subr.bf16.mxu1 %v3367_v9  ;;  %v3383_v20 = vld [vmem:[%s4774_s1 + $0xcc] ss:$20 sps:$4 sm:$0xff]   ;;  %v3387_v22 = vld [vmem:[%s4774_s1 + $0xc8] ss:$20 sps:$4 sm:$0xff]   ;;  %v3388_v23 = vld [vmem:[%s4774_s1 + $0xd0] ss:$20 sps:$4 sm:$0xff]  }
   0x9   :  { %v3389_v24 = vld [vmem:[%s4774_s1 + $0xf4] ss:$20 sps:$4 sm:$0xff]   ;;  %v3391_v25 = vld [vmem:[%s4774_s1 + $0xfc] ss:$20 sps:$4 sm:$0xff]   ;;  %v3394_v27 = vld [vmem:[%s4774_s1 + $0xf8] ss:$20 sps:$4 sm:$0xff]  }
   0xa   :  { %v3393_v26 = vld [vmem:[%s4774_s1 + $0xf0] ss:$20 sps:$4 sm:$0xff]   ;;  %v3399_v30 = vld [vmem:[%s4774_s1 + $0x118] ss:$20 sps:$4 sm:$0xff]   ;;  %v3400_v31 = vld [vmem:[%s4774_s1 + $0x120] ss:$20 sps:$4 sm:$0xff]  }
   0xb   :  { %1461 = vmatpush1.bf16.msra.mxu0 %v3369_v10  ;;  %1680 = vmatpush1.bf16.msra.mxu1 %v3370_v11  ;;  %v3395_v28 = vld [vmem:[%s4774_s1 + $0x11c] ss:$20 sps:$4 sm:$0xff]   ;;  %v3397_v29 = vld [vmem:[%s4774_s1 + $0x124] ss:$20 sps:$4 sm:$0xff]   ;;  %v3403_v33 = vld [vmem:[%s4774_s1 + $0x14c] ss:$20 sps:$4 sm:$0xff]  }
   0xc   :  { %1462 = vmatprep.subr.bf16.mxu0 %v3371_v12  ;;  %1681 = vmatprep.subr.bf16.mxu1 %v3373_v13  ;;  %v3401_v32 = vld [vmem:[%s4774_s1 + $0x144] ss:$20 sps:$4 sm:$0xff]   ;;  %v3405_v34 = vld [vmem:[%s4774_s1 + $0x140] ss:$20 sps:$4 sm:$0xff]   ;;  %v3406_v35 = vld [vmem:[%s4774_s1 + $0x148] ss:$20 sps:$4 sm:$0xff]  }
   0xd   :  { %v3407_v36 = vld [vmem:[%s4774_s1 + $0x16c] ss:$20 sps:$4 sm:$0xff]   ;;  %v3409_v37 = vld [vmem:[%s4774_s1 + $0x174] ss:$20 sps:$4 sm:$0xff]   ;;  %v3412_v39 = vld [vmem:[%s4774_s1 + $0x170] ss:$20 sps:$4 sm:$0xff]  }
   0xe   :  { %v3411_v38 = vld [vmem:[%s4774_s1 + $0x168] ss:$20 sps:$4 sm:$0xff]   ;;  %v3417_v42 = vld [vmem:[%s4774_s1 + $0x190] ss:$20 sps:$4 sm:$0xff]   ;;  %v3418_v43 = vld [vmem:[%s4774_s1 + $0x198] ss:$20 sps:$4 sm:$0xff]  }
   0xf   :  { %1463 = vmatpush1.bf16.msra.mxu0 %v3375_v14  ;;  %1682 = vmatpush1.bf16.msra.mxu1 %v3376_v15  ;;  %v3413_v40 = vld [vmem:[%s4774_s1 + $0x194] ss:$20 sps:$4 sm:$0xff]   ;;  %v3415_v41 = vld [vmem:[%s4774_s1 + $0x19c] ss:$20 sps:$4 sm:$0xff]   ;;  %v3421_v45 = vld [vmem:[%s4774_s1 + $0x1c4] ss:$20 sps:$4 sm:$0xff]  }
  0x10   :  { %1464 = vmatprep.subr.bf16.mxu0 %v3377_v16  ;;  %1683 = vmatprep.subr.bf16.mxu1 %v3379_v17  ;;  %v3419_v44 = vld [vmem:[%s4774_s1 + $0x1bc] ss:$20 sps:$4 sm:$0xff]   ;;  %v3423_v46 = vld [vmem:[%s4774_s1 + $0x1b8] ss:$20 sps:$4 sm:$0xff]   ;;  %v3424_v48 = vld [vmem:[%s4774_s1 + $0x1c0] ss:$20 sps:$4 sm:$0xff]  }
  0x11   :  { %v3449_v47 = vld [vmem:[%s4775_s0 + $0x4] ss:$20 sps:$4 sm:$0xff]   ;;  %v3427_v50 = vld [vmem:[%s4774_s1 + $0x1ec] ss:$20 sps:$4 sm:$0xff]   ;;  %v3430_v52 = vld [vmem:[%s4774_s1 + $0x1e8] ss:$20 sps:$4 sm:$0xff]  }
  0x12   :  { %v3425_v49 = vld [vmem:[%s4774_s1 + $0x1e4] ss:$20 sps:$4 sm:$0xff]   ;;  %1488 = vmatprep.mubr.bf16.mxu0 %v3449_v47  ;;  %1707 = vmatprep.mubr.bf16.mxu1 %v3449_v47  ;;  %v3429_v51 = vld [vmem:[%s4774_s1 + $0x1e0] ss:$20 sps:$4 sm:$0xff]   ;;  %v3435_v55 = vld [vmem:[%s4774_s1 + $0x208] ss:$20 sps:$4 sm:$0xff]  }
  0x13   :  { %1465 = vmatpush1.bf16.msra.mxu0 %v3381_v18  ;;  %1684 = vmatpush1.bf16.msra.mxu1 %v3382_v19  ;;  %v3431_v53 = vld [vmem:[%s4774_s1 + $0x20c] ss:$20 sps:$4 sm:$0xff]   ;;  %v3433_v54 = vld [vmem:[%s4774_s1 + $0x214] ss:$20 sps:$4 sm:$0xff]   ;;  %v3436_v56 = vld [vmem:[%s4774_s1 + $0x210] ss:$20 sps:$4 sm:$0xff]  }
  0x14   :  { %1466 = vmatprep.subr.bf16.mxu0 %v3383_v20  ;;  %1685 = vmatprep.subr.bf16.mxu1 %v3385_v21  ;;  %v3437_v57 = vld [vmem:[%s4774_s1 + $0x234] ss:$20 sps:$4 sm:$0xff]   ;;  %v3439_v58 = vld [vmem:[%s4774_s1 + $0x23c] ss:$20 sps:$4 sm:$0xff]   ;;  %v3442_v60 = vld [vmem:[%s4774_s1 + $0x238] ss:$20 sps:$4 sm:$0xff]  }
  0x15   :  { %v3441_v59 = vld [vmem:[%s4774_s1 + $0x230] ss:$20 sps:$4 sm:$0xff]   ;;  %v3447_v63 = vld [vmem:[%s4774_s1 + $0x258] ss:$20 sps:$4 sm:$0xff]   ;;  %v3448_v0 = vld [vmem:[%s4774_s1 + $0x260] ss:$20 sps:$4 sm:$0xff]  }
  0x16   :  { %v3443_v61 = vld [vmem:[%s4774_s1 + $0x25c] ss:$20 sps:$4 sm:$0xff]   ;;  %v3445_v62 = vld [vmem:[%s4774_s1 + $0x264] ss:$20 sps:$4 sm:$0xff]   ;;  %v3456_v2 = vld [vmem:[%s4774_s1 + $0x28c] ss:$20 sps:$4 sm:$0xff]  }
  0x17   :  { %1467 = vmatpush1.bf16.msra.mxu0 %v3387_v22  ;;  %1686 = vmatpush1.bf16.msra.mxu1 %v3388_v23  ;;  %v3453_v1 = vld [vmem:[%s4774_s1 + $0x284] ss:$20 sps:$4 sm:$0xff]   ;;  %v3451_v3 = vld [vmem:[%s4774_s1 + $0x280] ss:$20 sps:$4 sm:$0xff]   ;;  %v3454_v4 = vld [vmem:[%s4774_s1 + $0x288] ss:$20 sps:$4 sm:$0xff]  }
  0x18   :  { %1468 = vmatprep.subr.bf16.mxu0 %v3389_v24  ;;  %1687 = vmatprep.subr.bf16.mxu1 %v3391_v25  ;;  %v3457_v5 = vld [vmem:[%s4775_s0] ss:$20 sps:$4 sm:$0xff]   ;;  %v3458_v8 = vld [vmem:[%s4774_s1 + $0x2a8] ss:$20 sps:$4 sm:$0xff]   ;;  %v3461_v9 = vld [vmem:[%s4774_s1 + $0x2b0] ss:$20 sps:$4 sm:$0xff]  }
  0x19   :  { %v3460_v6 = vld [vmem:[%s4774_s1 + $0x2ac] ss:$20 sps:$4 sm:$0xff]   ;;  %v3463_v7 = vld [vmem:[%s4774_s1 + $0x2b4] ss:$20 sps:$4 sm:$0xff]   ;;  %v3469_v11 = vld [vmem:[%s4774_s1 + $0x2dc] ss:$20 sps:$4 sm:$0xff]  }
  0x1a   :  { %v3466_v10 = vld [vmem:[%s4774_s1 + $0x2d4] ss:$20 sps:$4 sm:$0xff]   ;;  %v3464_v12 = vld [vmem:[%s4774_s1 + $0x2d0] ss:$20 sps:$4 sm:$0xff]   ;;  %v3467_v13 = vld [vmem:[%s4774_s1 + $0x2d8] ss:$20 sps:$4 sm:$0xff]  }
  0x1b   :  { %1469 = vmatpush1.bf16.msra.mxu0 %v3393_v26  ;;  %1688 = vmatpush1.bf16.msra.mxu1 %v3394_v27  ;;  %v3512_v14 = vld [vmem:[%s4775_s0 + $0x2c] ss:$20 sps:$4 sm:$0xff]   ;;  %v3514_v15 = vld [vmem:[%s4775_s0 + $0x28] ss:$20 sps:$4 sm:$0xff]   ;;  %v3475_v17 = vld [vmem:[%s4774_s1 + $0x304] ss:$20 sps:$4 sm:$0xff]  }
  0x1c   :  { %1470 = vmatprep.subr.bf16.mxu0 %v3395_v28  ;;  %1689 = vmatprep.subr.bf16.mxu1 %v3397_v29  ;;  %v3472_v16 = vld [vmem:[%s4774_s1 + $0x2fc] ss:$20 sps:$4 sm:$0xff]   ;;  %v3470_v18 = vld [vmem:[%s4774_s1 + $0x2f8] ss:$20 sps:$4 sm:$0xff]   ;;  %v3473_v19 = vld [vmem:[%s4774_s1 + $0x300] ss:$20 sps:$4 sm:$0xff]  }
  0x1d   :  { %v3478_v20 = vld [vmem:[%s4774_s1 + $0x324] ss:$20 sps:$4 sm:$0xff]   ;;  %v3481_v21 = vld [vmem:[%s4774_s1 + $0x32c] ss:$20 sps:$4 sm:$0xff]   ;;  %v3527_v23 = vld [vmem:[%s4775_s0 + $0x54] ss:$20 sps:$4 sm:$0xff]  }
  0x1e   :  { %v3476_v22 = vld [vmem:[%s4774_s1 + $0x320] ss:$20 sps:$4 sm:$0xff]   ;;  %v3479_v24 = vld [vmem:[%s4774_s1 + $0x328] ss:$20 sps:$4 sm:$0xff]   ;;  %v3529_v25 = vld [vmem:[%s4775_s0 + $0x50] ss:$20 sps:$4 sm:$0xff]  }
  0x1f   :  { %1471 = vmatpush1.bf16.msra.mxu0 %v3399_v30  ;;  %1690 = vmatpush1.bf16.msra.mxu1 %v3400_v31  ;;  %v3484_v26 = vld [vmem:[%s4774_s1 + $0x34c] ss:$20 sps:$4 sm:$0xff]   ;;  %v3487_v27 = vld [vmem:[%s4774_s1 + $0x354] ss:$20 sps:$4 sm:$0xff]   ;;  %v3485_v29 = vld [vmem:[%s4774_s1 + $0x350] ss:$20 sps:$4 sm:$0xff]  }
  0x20   :  { %1472 = vmatprep.subr.bf16.mxu0 %v3401_v32  ;;  %1691 = vmatprep.subr.bf16.mxu1 %v3403_v33  ;;  %v3482_v28 = vld [vmem:[%s4774_s1 + $0x348] ss:$20 sps:$4 sm:$0xff]   ;;  %v3488_v33 = vld [vmem:[%s4774_s1 + $0x370] ss:$20 sps:$4 sm:$0xff]  }
  0x21   :  { %v3490_v30 = vld [vmem:[%s4774_s1 + $0x374] ss:$20 sps:$4 sm:$0xff]   ;;  %v3542_v31 = vld [vmem:[%s4775_s0 + $0x7c] ss:$20 sps:$4 sm:$0xff]  }
  0x22   :  { %v3493_v32 = vld [vmem:[%s4774_s1 + $0x37c] ss:$20 sps:$4 sm:$0xff]  }
  0x23   :  { %1473 = vmatpush1.bf16.msra.mxu0 %v3405_v34  ;;  %1692 = vmatpush1.bf16.msra.mxu1 %v3406_v35  ;;  %v3491_v34 = vld [vmem:[%s4774_s1 + $0x378] ss:$20 sps:$4 sm:$0xff]   ;;  %v3506_v47 = vld [vmem:[%s4774_s1 + $0x3e8] ss:$20 sps:$4 sm:$0xff]  }
  0x24   :  { %1474 = vmatprep.subr.bf16.mxu0 %v3407_v36  ;;  %1693 = vmatprep.subr.bf16.mxu1 %v3409_v37  ;;  %v3544_v35 = vld [vmem:[%s4775_s0 + $0x78] ss:$20 sps:$4 sm:$0xff]   ;;  %v3496_v36 = vld [vmem:[%s4774_s1 + $0x39c] ss:$20 sps:$4 sm:$0xff]  }
  0x25   :  { %v3499_v37 = vld [vmem:[%s4774_s1 + $0x3a4] ss:$20 sps:$4 sm:$0xff]  }
  0x27   :  { %1475 = vmatpush1.bf16.msra.mxu0 %v3411_v38  ;;  %1694 = vmatpush1.bf16.msra.mxu1 %v3412_v39  ;;  %v3494_v38 = vld [vmem:[%s4774_s1 + $0x398] ss:$20 sps:$4 sm:$0xff]   ;;  %v3497_v39 = vld [vmem:[%s4774_s1 + $0x3a0] ss:$20 sps:$4 sm:$0xff]  }
  0x28   :  { %1476 = vmatprep.subr.bf16.mxu0 %v3413_v40  ;;  %1695 = vmatprep.subr.bf16.mxu1 %v3415_v41  ;;  %v4087_v40 = vld [vmem:[%s4775_s0 + $0xc] ss:$20 sps:$4 sm:$0xff]   ;;  %v3502_v41 = vld [vmem:[%s4774_s1 + $0x3c4] ss:$20 sps:$4 sm:$0xff]  }
  0x2b   :  { %1477 = vmatpush1.bf16.msra.mxu0 %v3417_v42  ;;  %1696 = vmatpush1.bf16.msra.mxu1 %v3418_v43  ;;  %v3505_v42 = vld [vmem:[%s4774_s1 + $0x3cc] ss:$20 sps:$4 sm:$0xff]  }
  0x2c   :  { %1478 = vmatprep.subr.bf16.mxu0 %v3419_v44  ;;  %1697 = vmatprep.subr.bf16.mxu1 %v3421_v45  ;;  %v3500_v43 = vld [vmem:[%s4774_s1 + $0x3c0] ss:$20 sps:$4 sm:$0xff]   ;;  %v3503_v44 = vld [vmem:[%s4774_s1 + $0x3c8] ss:$20 sps:$4 sm:$0xff]  }
  0x2d   :  { %v3508_v45 = vld [vmem:[%s4774_s1 + $0x3ec] ss:$20 sps:$4 sm:$0xff]  }
  0x2f   :  { %1479 = vmatpush1.bf16.msra.mxu0 %v3423_v46  ;;  %1698 = vmatpush1.bf16.msra.mxu1 %v3424_v48  ;;  %v3511_v46 = vld [vmem:[%s4774_s1 + $0x3f4] ss:$20 sps:$4 sm:$0xff]   ;;  %v3509_v48 = vld [vmem:[%s4774_s1 + $0x3f0] ss:$20 sps:$4 sm:$0xff]  }
  0x30   :  { %1480 = vmatprep.subr.bf16.mxu0 %v3425_v49  ;;  %1699 = vmatprep.subr.bf16.mxu1 %v3427_v50  ;;  %v3517_v49 = vld [vmem:[%s4774_s1 + $0x414] ss:$20 sps:$4 sm:$0xff]   ;;  %v3520_v50 = vld [vmem:[%s4774_s1 + $0x41c] ss:$20 sps:$4 sm:$0xff]  }
  0x33   :  { %1481 = vmatpush1.bf16.msra.mxu0 %v3429_v51  ;;  %1700 = vmatpush1.bf16.msra.mxu1 %v3430_v52  ;;  %v3515_v51 = vld [vmem:[%s4774_s1 + $0x410] ss:$20 sps:$4 sm:$0xff]   ;;  %v3518_v52 = vld [vmem:[%s4774_s1 + $0x418] ss:$20 sps:$4 sm:$0xff]  }
  0x34   :  { %1482 = vmatprep.subr.bf16.mxu0 %v3431_v53  ;;  %1701 = vmatprep.subr.bf16.mxu1 %v3433_v54  ;;  %v3523_v53 = vld [vmem:[%s4774_s1 + $0x43c] ss:$20 sps:$4 sm:$0xff]   ;;  %v3526_v54 = vld [vmem:[%s4774_s1 + $0x444] ss:$20 sps:$4 sm:$0xff]  }
  0x37   :  { %1483 = vmatpush1.bf16.msra.mxu0 %v3435_v55  ;;  %1702 = vmatpush1.bf16.msra.mxu1 %v3436_v56  ;;  %v3521_v55 = vld [vmem:[%s4774_s1 + $0x438] ss:$20 sps:$4 sm:$0xff]   ;;  %v3524_v56 = vld [vmem:[%s4774_s1 + $0x440] ss:$20 sps:$4 sm:$0xff]  }
  0x38   :  { %1484 = vmatprep.subr.bf16.mxu0 %v3437_v57  ;;  %1703 = vmatprep.subr.bf16.mxu1 %v3439_v58  ;;  %v3532_v57 = vld [vmem:[%s4774_s1 + $0x464] ss:$20 sps:$4 sm:$0xff]   ;;  %v3535_v58 = vld [vmem:[%s4774_s1 + $0x46c] ss:$20 sps:$4 sm:$0xff]  }
  0x3b   :  { %1485 = vmatpush1.bf16.msra.mxu0 %v3441_v59  ;;  %1704 = vmatpush1.bf16.msra.mxu1 %v3442_v60  ;;  %v3530_v59 = vld [vmem:[%s4774_s1 + $0x460] ss:$20 sps:$4 sm:$0xff]   ;;  %v3533_v60 = vld [vmem:[%s4774_s1 + $0x468] ss:$20 sps:$4 sm:$0xff]  }
  0x3c   :  { %1486 = vmatprep.subr.bf16.mxu0 %v3443_v61  ;;  %1705 = vmatprep.subr.bf16.mxu1 %v3445_v62  ;;  %v3538_v61 = vld [vmem:[%s4774_s1 + $0x48c] ss:$20 sps:$4 sm:$0xff]   ;;  %v3541_v62 = vld [vmem:[%s4774_s1 + $0x494] ss:$20 sps:$4 sm:$0xff]  }
  0x3f   :  { %1487 = vmatpush1.bf16.msra.mxu0 %v3447_v63  ;;  %1706 = vmatpush1.bf16.msra.mxu1 %v3448_v0  ;;  %v3536_v63 = vld [vmem:[%s4774_s1 + $0x488] ss:$20 sps:$4 sm:$0xff]   ;;  %v3539_v0 = vld [vmem:[%s4774_s1 + $0x490] ss:$20 sps:$4 sm:$0xff]  }
  0x40   :  { %1529 = vmatprep.subr.bf16.mxu0 %v3453_v1  ;;  %1748 = vmatprep.subr.bf16.mxu1 %v3456_v2  ;;  %v3547_v1 = vld [vmem:[%s4774_s1 + $0x4b4] ss:$20 sps:$4 sm:$0xff]   ;;  %v3550_v2 = vld [vmem:[%s4774_s1 + $0x4bc] ss:$20 sps:$4 sm:$0xff]  }
  0x42   :  { %1489 = vmatmul.mubr.bf16.vlgmr.msra.gmra.mrb[0].mxu0 %v3457_v5  ;;  %1708 = vmatmul.mubr.bf16.vlgmr.msra.gmra.mrb[0].mxu1 %v3457_v5  ;;  %v3553_v5 = vld [vmem:[%s4774_s1 + $0x4dc] ss:$20 sps:$4 sm:$0xff]  }
  0x43   :  { %1530 = vmatpush1.bf16.msra.mxu0 %v3451_v3  ;;  %1749 = vmatpush1.bf16.msra.mxu1 %v3454_v4  ;;  %v3545_v3 = vld [vmem:[%s4774_s1 + $0x4b0] ss:$20 sps:$4 sm:$0xff]   ;;  %v3548_v4 = vld [vmem:[%s4774_s1 + $0x4b8] ss:$20 sps:$4 sm:$0xff]  }
  0x44   :  { %1531 = vmatprep.subr.bf16.mxu0 %v3460_v6  ;;  %1750 = vmatprep.subr.bf16.mxu1 %v3463_v7  ;;  %v3556_v6 = vld [vmem:[%s4774_s1 + $0x4e4] ss:$20 sps:$4 sm:$0xff]  }
  0x45   :  { %1498 = vmatprep.mubr.bf16.mxu0 %v3512_v14  ;;  %1717 = vmatprep.mubr.bf16.mxu1 %v3512_v14  ;;  %v3551_v7 = vld [vmem:[%s4774_s1 + $0x4d8] ss:$20 sps:$4 sm:$0xff]  }
  0x46   :  { %v3568_v14 = vld [vmem:[%s4774_s1 + $0x52c] ss:$20 sps:$4 sm:$0xff]  }
  0x47   :  { %1532 = vmatpush1.bf16.msra.mxu0 %v3458_v8  ;;  %1751 = vmatpush1.bf16.msra.mxu1 %v3461_v9  ;;  %v3554_v8 = vld [vmem:[%s4774_s1 + $0x4e0] ss:$20 sps:$4 sm:$0xff]   ;;  %v3562_v9 = vld [vmem:[%s4774_s1 + $0x504] ss:$20 sps:$4 sm:$0xff]  }
  0x48   :  { %1533 = vmatprep.subr.bf16.mxu0 %v3466_v10  ;;  %1752 = vmatprep.subr.bf16.mxu1 %v3469_v11  ;;  %v4193_v10 = vld [vmem:[%s4775_s0 + $0x8] ss:$20 sps:$4 sm:$0xff]   ;;  %v3565_v11 = vld [vmem:[%s4774_s1 + $0x50c] ss:$20 sps:$4 sm:$0xff]  }
  0x4a   :  { %1499 = vmatmul.mubr.bf16.gmra.mrb[4].mxu0 %v3514_v15  ;;  %1718 = vmatmul.mubr.bf16.gmra.mrb[4].mxu1 %v3514_v15  ;;  %v3571_v15 = vld [vmem:[%s4774_s1 + $0x534] ss:$20 sps:$4 sm:$0xff]  }
  0x4b   :  { %1534 = vmatpush1.bf16.msra.mxu0 %v3464_v12  ;;  %1753 = vmatpush1.bf16.msra.mxu1 %v3467_v13  ;;  %v3560_v12 = vld [vmem:[%s4774_s1 + $0x500] ss:$20 sps:$4 sm:$0xff]   ;;  %v3563_v13 = vld [vmem:[%s4774_s1 + $0x508] ss:$20 sps:$4 sm:$0xff]  }
  0x4c   :  { %1535 = vmatprep.subr.bf16.mxu0 %v3472_v16  ;;  %1754 = vmatprep.subr.bf16.mxu1 %v3475_v17  ;;  %v3566_v16 = vld [vmem:[%s4774_s1 + $0x528] ss:$20 sps:$4 sm:$0xff]  }
  0x4d   :  { %1508 = vmatprep.mubr.bf16.mxu0 %v3527_v23  ;;  %1727 = vmatprep.mubr.bf16.mxu1 %v3527_v23  ;;  %v4216_v17 = vld [vmem:[%s4775_s0 + $0x34] ss:$20 sps:$4 sm:$0xff]   ;;  %v3578_v23 = vld [vmem:[%s4774_s1 + $0x558] ss:$20 sps:$4 sm:$0xff]  }
  0x4f   :  { %1536 = vmatpush1.bf16.msra.mxu0 %v3470_v18  ;;  %1755 = vmatpush1.bf16.msra.mxu1 %v3473_v19  ;;  %v3569_v18 = vld [vmem:[%s4774_s1 + $0x530] ss:$20 sps:$4 sm:$0xff]   ;;  %v3577_v19 = vld [vmem:[%s4774_s1 + $0x554] ss:$20 sps:$4 sm:$0xff]  }
  0x50   :  { %1537 = vmatprep.subr.bf16.mxu0 %v3478_v20  ;;  %1756 = vmatprep.subr.bf16.mxu1 %v3481_v21  ;;  %v4229_v20 = vld [vmem:[%s4775_s0 + $0x30] ss:$20 sps:$4 sm:$0xff]  }
  0x51   :  { %v3580_v21 = vld [vmem:[%s4774_s1 + $0x55c] ss:$20 sps:$4 sm:$0xff]  }
  0x52   :  { %1509 = vmatmul.mubr.bf16.gmra.mrb[8].mxu0 %v3529_v25  ;;  %1728 = vmatmul.mubr.bf16.gmra.mrb[8].mxu1 %v3529_v25  ;;  %v3586_v25 = vld [vmem:[%s4774_s1 + $0x584] ss:$20 sps:$4 sm:$0xff]  }
  0x53   :  { %1538 = vmatpush1.bf16.msra.mxu0 %v3476_v22  ;;  %1757 = vmatpush1.bf16.msra.mxu1 %v3479_v24  ;;  %v3575_v22 = vld [vmem:[%s4774_s1 + $0x550] ss:$20 sps:$4 sm:$0xff]  }
  0x54   :  { %1539 = vmatprep.subr.bf16.mxu0 %v3484_v26  ;;  %1758 = vmatprep.subr.bf16.mxu1 %v3487_v27  ;;  %v3583_v24 = vld [vmem:[%s4774_s1 + $0x57c] ss:$20 sps:$4 sm:$0xff]   ;;  %v3581_v26 = vld [vmem:[%s4774_s1 + $0x578] ss:$20 sps:$4 sm:$0xff]  }
  0x55   :  { %1518 = vmatprep.mubr.bf16.mxu0 %v3542_v31  ;;  %1737 = vmatprep.mubr.bf16.mxu1 %v3542_v31  ;;  %v4254_v27 = vld [vmem:[%s4775_s0 + $0x5c] ss:$20 sps:$4 sm:$0xff]   ;;  %v3595_v31 = vld [vmem:[%s4774_s1 + $0x5ac] ss:$20 sps:$4 sm:$0xff]  }
  0x57   :  { %1540 = vmatpush1.bf16.msra.mxu0 %v3482_v28  ;;  %1759 = vmatpush1.bf16.msra.mxu1 %v3485_v29  ;;  %v3584_v28 = vld [vmem:[%s4774_s1 + $0x580] ss:$20 sps:$4 sm:$0xff]   ;;  %v3592_v29 = vld [vmem:[%s4774_s1 + $0x5a4] ss:$20 sps:$4 sm:$0xff]  }
  0x58   :  { %1541 = vmatprep.subr.bf16.mxu0 %v3490_v30  ;;  %1760 = vmatprep.subr.bf16.mxu1 %v3493_v32  ;;  %v4267_v30 = vld [vmem:[%s4775_s0 + $0x58] ss:$20 sps:$4 sm:$0xff]   ;;  %v3590_v32 = vld [vmem:[%s4774_s1 + $0x5a0] ss:$20 sps:$4 sm:$0xff]  }
  0x5a   :  { %1519 = vmatmul.mubr.bf16.gmra.mrb[12].mxu0 %v3544_v35  ;;  %1738 = vmatmul.mubr.bf16.gmra.mrb[12].mxu1 %v3544_v35  ;;  %v3601_v35 = vld [vmem:[%s4774_s1 + $0x5d4] ss:$20 sps:$4 sm:$0xff]  }
  0x5b   :  { %1542 = vmatpush1.bf16.msra.mxu0 %v3488_v33  ;;  %1761 = vmatpush1.bf16.msra.mxu1 %v3491_v34  ;;  %v3593_v33 = vld [vmem:[%s4774_s1 + $0x5a8] ss:$20 sps:$4 sm:$0xff]   ;;  %v3598_v34 = vld [vmem:[%s4774_s1 + $0x5cc] ss:$20 sps:$4 sm:$0xff]  }
  0x5c   :  { %1543 = vmatprep.subr.bf16.mxu0 %v3496_v36  ;;  %1762 = vmatprep.subr.bf16.mxu1 %v3499_v37  ;;  %v3596_v36 = vld [vmem:[%s4774_s1 + $0x5c8] ss:$20 sps:$4 sm:$0xff]   ;;  %v4292_v37 = vld [vmem:[%s4775_s0 + $0x84] ss:$20 sps:$4 sm:$0xff]  }
  0x5d   :  { %1561 = vmatprep.mubr.bf16.mxu0 %v4087_v40  ;;  %1780 = vmatprep.mubr.bf16.mxu1 %v4087_v40 }
  0x5f   :  { %1544 = vmatpush1.bf16.msra.mxu0 %v3494_v38  ;;  %1763 = vmatpush1.bf16.msra.mxu1 %v3497_v39  ;;  %v3599_v38 = vld [vmem:[%s4774_s1 + $0x5d0] ss:$20 sps:$4 sm:$0xff]   ;;  %v3607_v39 = vld [vmem:[%s4774_s1 + $0x5f4] ss:$20 sps:$4 sm:$0xff]  }
  0x60   :  { %1545 = vmatprep.subr.bf16.mxu0 %v3502_v41  ;;  %1764 = vmatprep.subr.bf16.mxu1 %v3505_v42  ;;  %v4305_v41 = vld [vmem:[%s4775_s0 + $0x80] ss:$20 sps:$4 sm:$0xff]   ;;  %v3610_v42 = vld [vmem:[%s4774_s1 + $0x5fc] ss:$20 sps:$4 sm:$0xff]  }
  0x63   :  { %1546 = vmatpush1.bf16.msra.mxu0 %v3500_v43  ;;  %1765 = vmatpush1.bf16.msra.mxu1 %v3503_v44  ;;  %v3605_v43 = vld [vmem:[%s4774_s1 + $0x5f0] ss:$20 sps:$4 sm:$0xff]   ;;  %v3608_v44 = vld [vmem:[%s4774_s1 + $0x5f8] ss:$20 sps:$4 sm:$0xff]  }
  0x64   :  { %1547 = vmatprep.subr.bf16.mxu0 %v3508_v45  ;;  %1766 = vmatprep.subr.bf16.mxu1 %v3511_v46  ;;  %v3613_v45 = vld [vmem:[%s4774_s1 + $0x61c] ss:$20 sps:$4 sm:$0xff]   ;;  %v3616_v46 = vld [vmem:[%s4774_s1 + $0x624] ss:$20 sps:$4 sm:$0xff]  }
  0x67   :  { %1548 = vmatpush1.bf16.msra.mxu0 %v3506_v47  ;;  %1767 = vmatpush1.bf16.msra.mxu1 %v3509_v48  ;;  %v3611_v47 = vld [vmem:[%s4774_s1 + $0x618] ss:$20 sps:$4 sm:$0xff]   ;;  %v3614_v48 = vld [vmem:[%s4774_s1 + $0x620] ss:$20 sps:$4 sm:$0xff]  }
  0x68   :  { %1549 = vmatprep.subr.bf16.mxu0 %v3517_v49  ;;  %1768 = vmatprep.subr.bf16.mxu1 %v3520_v50  ;;  %v3618_v49 = vld [vmem:[%s4774_s1 + $0x150] ss:$20 sps:$4 sm:$0xff]  }
  0x69   :  { %v4338_v50 = vld [vmem:[%s4775_s0 + $0x10] ss:$20 sps:$4 sm:$0xff]  }
  0x6b   :  { %1550 = vmatpush1.bf16.msra.mxu0 %v3515_v51  ;;  %1769 = vmatpush1.bf16.msra.mxu1 %v3518_v52  ;;  %v3620_v51 = vld [vmem:[%s4774_s1 + $0x3d0] ss:$20 sps:$4 sm:$0xff]   ;;  %v3741_v52 = vmov 0  }
  0x6c   :  { %1551 = vmatprep.subr.bf16.mxu0 %v3523_v53  ;;  %1770 = vmatprep.subr.bf16.mxu1 %v3526_v54  ;;  %v3619_v53 = vld [vmem:[%s4774_s1 + $0x10] ss:$20 sps:$4 sm:$0xff]  }
  0x6d   :  { %v3621_v54 = vld [vmem:[%s4774_s1 + $0x290] ss:$20 sps:$4 sm:$0xff]  }
  0x6f   :  { %1552 = vmatpush1.bf16.msra.mxu0 %v3521_v55  ;;  %1771 = vmatpush1.bf16.msra.mxu1 %v3524_v56  ;;  %v3622_v55 = vld [vmem:[%s4774_s1 + $0x178] ss:$20 sps:$4 sm:$0xff]  }
  0x70   :  { %1553 = vmatprep.subr.bf16.mxu0 %v3532_v57  ;;  %1772 = vmatprep.subr.bf16.mxu1 %v3535_v58  ;;  %v3624_v56 = vld [vmem:[%s4774_s1 + $0x3f8] ss:$20 sps:$4 sm:$0xff]  }
  0x71   :  { %v3623_v57 = vld [vmem:[%s4774_s1 + $0x38] ss:$20 sps:$4 sm:$0xff]  }
  0x72   :  { %v3625_v58 = vld [vmem:[%s4774_s1 + $0x2b8] ss:$20 sps:$4 sm:$0xff]  }
  0x73   :  { %1554 = vmatpush1.bf16.msra.mxu0 %v3530_v59  ;;  %1773 = vmatpush1.bf16.msra.mxu1 %v3533_v60  ;;  %v3627_v59 = vld [vmem:[%s4774_s1 + $0x1a0] ss:$20 sps:$4 sm:$0xff]   ;;  %v4371_v60 = vld [vmem:[%s4775_s0 + $0x38] ss:$20 sps:$4 sm:$0xff]  }
  0x74   :  { %1555 = vmatprep.subr.bf16.mxu0 %v3538_v61  ;;  %1774 = vmatprep.subr.bf16.mxu1 %v3541_v62  ;;  %v3629_v61 = vld [vmem:[%s4774_s1 + $0x420] ss:$20 sps:$4 sm:$0xff]  }
  0x75   :  { %v3628_v62 = vld [vmem:[%s4774_s1 + $0x60] ss:$20 sps:$4 sm:$0xff]  }
  0x77   :  { %1556 = vmatpush1.bf16.msra.mxu0 %v3536_v63  ;;  %1775 = vmatpush1.bf16.msra.mxu1 %v3539_v0  ;;  %v3630_v63 = vld [vmem:[%s4774_s1 + $0x2e0] ss:$20 sps:$4 sm:$0xff]   ;;  %v3631_v0 = vld [vmem:[%s4774_s1 + $0x1c8] ss:$20 sps:$4 sm:$0xff]  }
  0x78   :  { %1557 = vmatprep.subr.bf16.mxu0 %v3547_v1  ;;  %1776 = vmatprep.subr.bf16.mxu1 %v3550_v2  ;;  %v3633_v1 = vld [vmem:[%s4774_s1 + $0x448] ss:$20 sps:$4 sm:$0xff]  }
  0x79   :  { %v3632_v2 = vld [vmem:[%s4774_s1 + $0x88] ss:$20 sps:$4 sm:$0xff]  }
  0x7b   :  { %1558 = vmatpush1.bf16.msra.mxu0 %v3545_v3  ;;  %1777 = vmatpush1.bf16.msra.mxu1 %v3548_v4  ;;  %v3634_v3 = vld [vmem:[%s4774_s1 + $0x308] ss:$20 sps:$4 sm:$0xff]   ;;  %v3636_v4 = vld [vmem:[%s4774_s1 + $0x1f0] ss:$20 sps:$4 sm:$0xff]  }
  0x7c   :  { %1559 = vmatprep.subr.bf16.mxu0 %v3553_v5  ;;  %1778 = vmatprep.subr.bf16.mxu1 %v3556_v6  ;;  %v4404_v5 = vld [vmem:[%s4775_s0 + $0x60] ss:$20 sps:$4 sm:$0xff]   ;;  %v3638_v6 = vld [vmem:[%s4774_s1 + $0x470] ss:$20 sps:$4 sm:$0xff]  }
  0x7f   :  { %1560 = vmatpush1.bf16.msra.mxu0 %v3551_v7  ;;  %1779 = vmatpush1.bf16.msra.mxu1 %v3554_v8  ;;  %v3637_v7 = vld [vmem:[%s4774_s1 + $0xb0] ss:$20 sps:$4 sm:$0xff]  }
  0x80   :  { %1602 = vmatprep.subr.bf16.mxu0 %v3562_v9  ;;  %1821 = vmatprep.subr.bf16.mxu1 %v3565_v11  ;;  %v3639_v8 = vld [vmem:[%s4774_s1 + $0x330] ss:$20 sps:$4 sm:$0xff]   ;;  %v3640_v9 = vld [vmem:[%s4774_s1 + $0x218] ss:$20 sps:$4 sm:$0xff]  }
  0x81   :  { %v3642_v11 = vld [vmem:[%s4774_s1 + $0x498] ss:$20 sps:$4 sm:$0xff]  }
  0x82   :  { %1562 = vmatmul.mubr.bf16.vlgmr.msra.gmra.mrb[0].mxu0 %v4193_v10  ;;  %1781 = vmatmul.mubr.bf16.vlgmr.msra.gmra.mrb[0].mxu1 %v4193_v10 }
  0x83   :  { %1603 = vmatpush1.bf16.msra.mxu0 %v3560_v12  ;;  %1822 = vmatpush1.bf16.msra.mxu1 %v3563_v13  ;;  %v3641_v12 = vld [vmem:[%s4774_s1 + $0xd8] ss:$20 sps:$4 sm:$0xff]  }
  0x84   :  { %1604 = vmatprep.subr.bf16.mxu0 %v3568_v14  ;;  %1823 = vmatprep.subr.bf16.mxu1 %v3571_v15  ;;  %v3643_v13 = vld [vmem:[%s4774_s1 + $0x358] ss:$20 sps:$4 sm:$0xff]   ;;  %v3645_v14 = vld [vmem:[%s4774_s1 + $0x240] ss:$20 sps:$4 sm:$0xff]   ;;  %v4437_v15 = vld [vmem:[%s4775_s0 + $0x88] ss:$20 sps:$4 sm:$0xff]  }
  0x85   :  { %1571 = vmatprep.mubr.bf16.mxu0 %v4216_v17  ;;  %1790 = vmatprep.mubr.bf16.mxu1 %v4216_v17 }
  0x87   :  { %1605 = vmatpush1.bf16.msra.mxu0 %v3566_v16  ;;  %1824 = vmatpush1.bf16.msra.mxu1 %v3569_v18  ;;  %v3647_v16 = vld [vmem:[%s4774_s1 + $0x4c0] ss:$20 sps:$4 sm:$0xff]  }
  0x88   :  { %1606 = vmatprep.subr.bf16.mxu0 %v3577_v19  ;;  %1825 = vmatprep.subr.bf16.mxu1 %v3580_v21  ;;  %v3646_v18 = vld [vmem:[%s4774_s1 + $0x100] ss:$20 sps:$4 sm:$0xff]   ;;  %v3649_v21 = vld [vmem:[%s4774_s1 + $0x268] ss:$20 sps:$4 sm:$0xff]  }
  0x89   :  { %v3648_v19 = vld [vmem:[%s4774_s1 + $0x380] ss:$20 sps:$4 sm:$0xff]  }
  0x8a   :  { %1572 = vmatmul.mubr.bf16.gmra.mrb[4].mxu0 %v4229_v20  ;;  %1791 = vmatmul.mubr.bf16.gmra.mrb[4].mxu1 %v4229_v20 }
  0x8b   :  { %1607 = vmatpush1.bf16.msra.mxu0 %v3575_v22  ;;  %1826 = vmatpush1.bf16.msra.mxu1 %v3578_v23  ;;  %v3651_v22 = vld [vmem:[%s4774_s1 + $0x4e8] ss:$20 sps:$4 sm:$0xff]  }
  0x8c   :  { %1608 = vmatprep.subr.bf16.mxu0 %v3583_v24  ;;  %1827 = vmatprep.subr.bf16.mxu1 %v3586_v25  ;;  %v3650_v23 = vld [vmem:[%s4774_s1 + $0x128] ss:$20 sps:$4 sm:$0xff]   ;;  %v3653_v25 = vld [vmem:[%s4774_s1 + $0x510] ss:$20 sps:$4 sm:$0xff]  }
  0x8d   :  { %1581 = vmatprep.mubr.bf16.mxu0 %v4254_v27  ;;  %1800 = vmatprep.mubr.bf16.mxu1 %v4254_v27  ;;  %v3652_v24 = vld [vmem:[%s4774_s1 + $0x3a8] ss:$20 sps:$4 sm:$0xff]  }
  0x8f   :  { %1609 = vmatpush1.bf16.msra.mxu0 %v3581_v26  ;;  %1828 = vmatpush1.bf16.msra.mxu1 %v3584_v28  ;;  %v3661_v26 = vld [vmem:[%s4776_s3 + $0x40] sm:$0xff]  }
  0x90   :  { %1610 = vmatprep.subr.bf16.mxu0 %v3592_v29  ;;  %1829 = vmatprep.subr.bf16.mxu1 %v3595_v31  ;;  %v3733_v28 = vld [vmem:[%s4775_s0 + $0x4] ss:$20 sps:$4 sm:$0xff]  }
  0x91   :  { %v3654_v29 = vld [vmem:[%s4774_s1 + $0x538] ss:$20 sps:$4 sm:$0xff]   ;;  %v3663_v31 = vld [vmem:[%s4776_s3] sm:$0xff]  }
  0x92   :  { %1582 = vmatmul.mubr.bf16.gmra.mrb[8].mxu0 %v4267_v30  ;;  %1801 = vmatmul.mubr.bf16.gmra.mrb[8].mxu1 %v4267_v30 }
  0x93   :  { %1611 = vmatpush1.bf16.msra.mxu0 %v3590_v32  ;;  %1830 = vmatpush1.bf16.msra.mxu1 %v3593_v33  ;;  %v3734_v32 = vld [vmem:[%s4775_s0] ss:$20 sps:$4 sm:$0xff]  }
  0x94   :  { %1612 = vmatprep.subr.bf16.mxu0 %v3598_v34  ;;  %1831 = vmatprep.subr.bf16.mxu1 %v3601_v35  ;;  %v3735_v33 = vld [vmem:[%s4775_s0 + $0x2c] ss:$20 sps:$4 sm:$0xff]   ;;  %v3656_v35 = vld [vmem:[%s4774_s1 + $0x588] ss:$20 sps:$4 sm:$0xff]  }
  0x95   :  { %1591 = vmatprep.mubr.bf16.mxu0 %v4292_v37  ;;  %1810 = vmatprep.mubr.bf16.mxu1 %v4292_v37  ;;  %v3655_v34 = vld [vmem:[%s4774_s1 + $0x560] ss:$20 sps:$4 sm:$0xff]  }
  0x97   :  { %1613 = vmatpush1.bf16.msra.mxu0 %v3596_v36  ;;  %1832 = vmatpush1.bf16.msra.mxu1 %v3599_v38  ;;  %v3669_v36 = vld [vmem:[%s4776_s3 + $0x50] sm:$0xff]  }
  0x98   :  { %1614 = vmatprep.subr.bf16.mxu0 %v3607_v39  ;;  %1833 = vmatprep.subr.bf16.mxu1 %v3610_v42  ;;  %v3671_v38 = vld [vmem:[%s4776_s3 + $0x10] sm:$0xff]   ;;  %v3673_v42 = vld [vmem:[%s4776_s3 + $0x58] sm:$0xff]  }
  0x99   :  { %v3737_v39 = vld [vmem:[%s4775_s0 + $0x54] ss:$20 sps:$4 sm:$0xff]  }
  0x9a   :  { %1592 = vmatmul.mubr.bf16.gmra.mrb[12].mxu0 %v4305_v41  ;;  %1811 = vmatmul.mubr.bf16.gmra.mrb[12].mxu1 %v4305_v41 }
  0x9b   :  { %1615 = vmatpush1.bf16.msra.mxu0 %v3605_v43  ;;  %1834 = vmatpush1.bf16.msra.mxu1 %v3608_v44  ;;  %v3657_v43 = vld [vmem:[%s4774_s1 + $0x5b0] ss:$20 sps:$4 sm:$0xff]   ;;  %v3675_v44 = vld [vmem:[%s4776_s3 + $0x18] sm:$0xff]  }
  0x9c   :  { %1616 = vmatprep.subr.bf16.mxu0 %v3613_v45  ;;  %1835 = vmatprep.subr.bf16.mxu1 %v3616_v46  ;;  %v3738_v45 = vld [vmem:[%s4775_s0 + $0x50] ss:$20 sps:$4 sm:$0xff]  }
  0x9d   :  { %1634 = vmatprep.mubr.bf16.mxu0 %v3741_v52  ;;  %1853 = vmatprep.mubr.bf16.mxu1 %v3741_v52  ;;  %v3739_v46 = vld [vmem:[%s4775_s0 + $0x7c] ss:$20 sps:$4 sm:$0xff]  }
  0x9f   :  { %1617 = vmatpush1.bf16.msra.mxu0 %v3611_v47  ;;  %1836 = vmatpush1.bf16.msra.mxu1 %v3614_v48  ;;  %v3659_v47 = vld [vmem:[%s4774_s1 + $0x600] ss:$20 sps:$4 sm:$0xff]   ;;  %v3660_v48 = vld [vmem:[%s4774_s1 + $0x628] ss:$20 sps:$4 sm:$0xff]  }
  0xa0   :  { %3024 = vmatprep.subr.bf16.mxu0 %v3618_v49  ;;  %3064 = vmatprep.subr.bf16.mxu1 %v3620_v51  ;;  %v3681_v49 = vld [vmem:[%s4776_s3 + $0x68] sm:$0xff]   ;;  %v3662_v51 = vld [vmem:[%s4776_s3 + $0xc0] sm:$0xff]  }
  0xa2   :  { %1635 = vmatmul.mubr.bf16.vlgmr.msra.gmra.mrb[0].mxu0 %v4338_v50  ;;  %1854 = vmatmul.mubr.bf16.vlgmr.msra.gmra.mrb[0].mxu1 %v4338_v50 }
  0xa3   :  { %3025 = vmatpush3.bf16.msra.mxu0 %v3619_v53  ;;  %3065 = vmatpush3.bf16.msra.mxu1 %v3621_v54  ;;  %v3666_v53 = vld [vmem:[%s4776_s3 + $0xc8] sm:$0xff]   ;;  %v3672_v54 = vld [vmem:[%s4776_s3 + $0x90] sm:$0xff]  }
  0xa4   :  { %3026 = vmatprep.subr.bf16.mxu0 %v3622_v55  ;;  %3066 = vmatprep.subr.bf16.mxu1 %v3624_v56  ;;  %v3674_v55 = vld [vmem:[%s4776_s3 + $0xd8] sm:$0xff]  }
  0xa5   :  { %1644 = vmatprep.mubr.bf16.mxu0 %v3741_v52  ;;  %1863 = vmatprep.mubr.bf16.mxu1 %v3741_v52  ;;  %v3676_v56 = vld [vmem:[%s4776_s3 + $0x98] sm:$0xff]  }
  0xa7   :  { %3027 = vmatpush3.bf16.msra.mxu0 %v3623_v57  ;;  %3067 = vmatpush3.bf16.msra.mxu1 %v3625_v58  ;;  %v3678_v57 = vld [vmem:[%s4776_s3 + $0xe0] sm:$0xff]  }
  0xa8   :  { %3028 = vmatprep.subr.bf16.mxu0 %v3627_v59  ;;  %3068 = vmatprep.subr.bf16.mxu1 %v3629_v61  ;;  %v3680_v58 = vld [vmem:[%s4776_s3 + $0xa0] sm:$0xff]   ;;  %v3682_v59 = vld [vmem:[%s4776_s3 + $0xe8] sm:$0xff]  }
  0xa9   :  { %v3684_v61 = vld [vmem:[%s4776_s3 + $0xa8] sm:$0xff]  }
  0xaa   :  { %1645 = vmatmul.mubr.bf16.gmra.mrb[4].mxu0 %v4371_v60  ;;  %1864 = vmatmul.mubr.bf16.gmra.mrb[4].mxu1 %v4371_v60 }
  0xab   :  { %3029 = vmatpush3.bf16.msra.mxu0 %v3628_v62  ;;  %3069 = vmatpush3.bf16.msra.mxu1 %v3630_v63  ;;  %v3685_v62 = vld [vmem:[%s4776_s3 + $0x70] sm:$0xff]  }
  0xac   :  { %3030 = vmatprep.subr.bf16.mxu0 %v3631_v0  ;;  %3070 = vmatprep.subr.bf16.mxu1 %v3633_v1  ;;  %v3686_v63 = vld [vmem:[%s4776_s3 + $0xf0] sm:$0xff]  }
  0xad   :  { %1654 = vmatprep.mubr.bf16.mxu0 %v3741_v52  ;;  %1873 = vmatprep.mubr.bf16.mxu1 %v3741_v52  ;;  %v3687_v0 = vld [vmem:[%s4776_s3 + $0x30] sm:$0xff]  }
  0xae   :  { %v3688_v1 = vld [vmem:[%s4776_s3 + $0xb0] sm:$0xff]  }
  0xaf   :  { %3031 = vmatpush3.bf16.msra.mxu0 %v3632_v2  ;;  %3071 = vmatpush3.bf16.msra.mxu1 %v3634_v3  ;;  %v3689_v2 = vld [vmem:[%s4776_s3 + $0x78] sm:$0xff]  }
  0xb0   :  { %3032 = vmatprep.subr.bf16.mxu0 %v3636_v4  ;;  %3072 = vmatprep.subr.bf16.mxu1 %v3638_v6  ;;  %v3690_v3 = vld [vmem:[%s4776_s3 + $0xf8] sm:$0xff]   ;;  %v4623_v6 = vld [vmem:[%s4776_s3 + $0x100] sm:$0xff]  }
  0xb1   :  { %v3691_v4 = vld [vmem:[%s4776_s3 + $0x38] sm:$0xff]  }
  0xb2   :  { %1655 = vmatmul.mubr.bf16.gmra.mrb[8].mxu0 %v4404_v5  ;;  %1874 = vmatmul.mubr.bf16.gmra.mrb[8].mxu1 %v4404_v5 }
  0xb3   :  { %3033 = vmatpush3.bf16.msra.mxu0 %v3637_v7  ;;  %3073 = vmatpush3.bf16.msra.mxu1 %v3639_v8  ;;  %v287_v7 = vlaneseq }
  0xb4   :  { %3034 = vmatprep.subr.bf16.mxu0 %v3640_v9  ;;  %3074 = vmatprep.subr.bf16.mxu1 %v3642_v11 }
  0xb5   :  { %1664 = vmatprep.mubr.bf16.mxu0 %v3741_v52  ;;  %1883 = vmatprep.mubr.bf16.mxu1 %v3741_v52  ;;  %v3664_v52 = vld [vmem:[%s4776_s3 + $0x80] sm:$0xff]   ;;  %v4626_v8 = vshrl.u32 %v287_v7, 7 }
  0xb7   :  { %3035 = vmatpush3.bf16.msra.mxu0 %v3641_v12  ;;  %3075 = vmatpush3.bf16.msra.mxu1 %v3643_v13  ;;  %v289_v9 = vsub.s32 0, %v4626_v8  ;;  %v297_v11 = vsub.s32 2, %v4626_v8  ;;  %v4633_v12 = vld [vmem:[%s4777_s2] sm:$0x1f]  ;;  %v293_v13 = vsub.s32 1, %v4626_v8 }
  0xb8   :  { %3036 = vmatprep.subr.bf16.mxu0 %v3645_v14  ;;  %3076 = vmatprep.subr.bf16.mxu1 %v3647_v16  ;;  %v301_v14 = vsub.s32 3, %v4626_v8 }
  0xb9   :  { %v4641_v16 = vrot.slane %v4633_v12, %v297_v11 }
  0xba   :  { %1665 = vmatmul.mubr.bf16.gmra.mrb[12].mxu0 %v4437_v15  ;;  %1884 = vmatmul.mubr.bf16.gmra.mrb[12].mxu1 %v4437_v15 }
  0xbb   :  { %3037 = vmatpush3.bf16.msra.mxu0 %v3646_v18  ;;  %3077 = vmatpush3.bf16.msra.mxu1 %v3648_v19  ;;  %v4644_v18 = vrot.slane %v4633_v12, %v293_v13  ;;  %v4647_v19 = vrot.slane %v4633_v12, %v301_v14 }
  0xbc   :  { %3038 = vmatprep.subr.bf16.mxu0 %v3649_v21  ;;  %3078 = vmatprep.subr.bf16.mxu1 %v3651_v22 }
  0xbd   :  { %1926 = vmatprep.mubr.bf16.mxu0 %v3733_v28  ;;  %1991 = vmatprep.mubr.bf16.mxu1 %v4087_v40  ;;  %v3665_v40 = vld [vmem:[%s4776_s3 + $0x48] sm:$0xff]  }
  0xbf   :  { %3039 = vmatpush3.bf16.msra.mxu0 %v3650_v23  ;;  %3079 = vmatpush3.bf16.msra.mxu1 %v3652_v24 }
  0xc0   :  { %3208 = vmatprep.subr.bf16.mxu0 %v3653_v25  ;;  %3116 = vmatprep.subr.bf16.mxu1 %v3661_v26 }
  0xc2   :  { %1927 = vmatmul.mubr.bf16.vlgmr.msra.gmra.mrb[16].mxu0 %v3734_v32  ;;  %1992 = vmatmul.mubr.bf16.vlgmr.msra.gmra.mrb[16].mxu1 %v4193_v10  ;;  %v3667_v10 = vld [vmem:[%s4776_s3 + $0x8] sm:$0xff]  }
  0xc3   :  { %3209 = vmatpush3.bf16.msra.mxu0 %v3653_v25  ;;  %1934 = vmatprep.mubr.bf16.mxu0 %v3735_v33 }
  0xc4   :  { %3210 = vmatprep.subr.bf16.mxu0 %v3654_v29  ;;  %1999 = vmatprep.mubr.bf16.mxu1 %v4216_v17  ;;  %v3736_v17 = vld [vmem:[%s4775_s0 + $0x28] ss:$20 sps:$4 sm:$0xff]  }
  0xc5   :  { %3117 = vmatpush3.bf16.msra.mxu1 %v3663_v31 }
  0xc6   :  { %3118 = vmatprep.subr.bf16.mxu1 %v3665_v40 }
  0xc7   :  { %3211 = vmatpush3.bf16.msra.mxu0 %v3654_v29 }
  0xc8   :  { %3212 = vmatprep.subr.bf16.mxu0 %v3655_v34 }
  0xc9   :  { %3119 = vmatpush3.bf16.msra.mxu1 %v3667_v10 }
  0xca   :  { %1935 = vmatmul.mubr.bf16.gmra.mrb[20].mxu0 %v3736_v17  ;;  %2000 = vmatmul.mubr.bf16.gmra.mrb[20].mxu1 %v4229_v20  ;;  %v3658_v20 = vld [vmem:[%s4774_s1 + $0x5d8] ss:$20 sps:$4 sm:$0xff]  }
  0xcb   :  { %3213 = vmatpush3.bf16.msra.mxu0 %v3655_v34  ;;  %1942 = vmatprep.mubr.bf16.mxu0 %v3737_v39 }
  0xcc   :  { %3214 = vmatprep.subr.bf16.mxu0 %v3656_v35  ;;  %2007 = vmatprep.mubr.bf16.mxu1 %v4254_v27  ;;  %v3677_v27 = vld [vmem:[%s4776_s3 + $0x60] sm:$0xff]  }
  0xcd   :  { %3120 = vmatprep.subr.bf16.mxu1 %v3669_v36 }
  0xce   :  { %3121 = vmatpush3.bf16.msra.mxu1 %v3671_v38 }
  0xcf   :  { %3215 = vmatpush3.bf16.msra.mxu0 %v3656_v35  ;;  %3122 = vmatprep.subr.bf16.mxu1 %v3673_v42 }
  0xd0   :  { %3216 = vmatprep.subr.bf16.mxu0 %v3657_v43 }
  0xd2   :  { %1943 = vmatmul.mubr.bf16.gmra.mrb[24].mxu0 %v3738_v45  ;;  %2008 = vmatmul.mubr.bf16.gmra.mrb[24].mxu1 %v4267_v30  ;;  %v3679_v30 = vld [vmem:[%s4776_s3 + $0x20] sm:$0xff]  }
  0xd3   :  { %3217 = vmatpush3.bf16.msra.mxu0 %v3657_v43  ;;  %1950 = vmatprep.mubr.bf16.mxu0 %v3739_v46 }
  0xd4   :  { %3218 = vmatprep.subr.bf16.mxu0 %v3658_v20  ;;  %2015 = vmatprep.mubr.bf16.mxu1 %v4292_v37  ;;  %v3740_v37 = vld [vmem:[%s4775_s0 + $0x78] ss:$20 sps:$4 sm:$0xff]  }
  0xd5   :  { %3123 = vmatpush3.bf16.msra.mxu1 %v3675_v44 }
  0xd6   :  { %3124 = vmatprep.subr.bf16.mxu1 %v3677_v27 }
  0xd7   :  { %3219 = vmatpush3.bf16.msra.mxu0 %v3658_v20 }
  0xd8   :  { %3220 = vmatprep.subr.bf16.mxu0 %v3659_v47 }
  0xd9   :  { %3125 = vmatpush3.bf16.msra.mxu1 %v3679_v30 }
  0xda   :  { %1951 = vmatmul.mubr.bf16.gmra.mrb[28].mxu0 %v3740_v37  ;;  %2016 = vmatmul.mubr.bf16.gmra.mrb[28].mxu1 %v4305_v41  ;;  %v3668_v41 = vld [vmem:[%s4776_s3 + $0x88] sm:$0xff]  }
  0xdb   :  { %3221 = vmatpush3.bf16.msra.mxu0 %v3659_v47  ;;  %3224 = vmatprep.mubr.bf16.mxu0 %v4338_v50  ;;  %v3670_v50 = vld [vmem:[%s4776_s3 + $0xd0] sm:$0xff]  }
  0xdc   :  { %3222 = vmatprep.subr.bf16.mxu0 %v3660_v48  ;;  %3126 = vmatprep.subr.bf16.mxu1 %v3681_v49 }
  0xdf   :  { %3223 = vmatpush3.bf16.msra.mxu0 %v3660_v48 }
  0xe0   :  { %3156 = vmatprep.subr.bf16.mxu0 %v3662_v51 }
  0xe2   :  { %3225 = vmatmul.mubr.bf16.vlgmr.msra.gmra.mrb[32].mxu0 %v4371_v60  ;;  %v3683_v60 = vld [vmem:[%s4776_s3 + $0x28] sm:$0xff]  }
  0xe3   :  { %3228 = vmatprep.mubr.bf16.mxu0 %v4404_v5  ;;  %3157 = vmatpush3.bf16.msra.mxu0 %v3664_v52  ;;  %v3692_v5 = vld [vmem:[%s4776_s3 + $0xb8] sm:$0xff]  }
  0xe4   :  { %3158 = vmatprep.subr.bf16.mxu0 %v3666_v53  ;;  %3127 = vmatpush3.bf16.msra.mxu1 %v3683_v60 }
  0xe5   :  { %3128 = vmatprep.subr.bf16.mxu1 %v3685_v62 }
  0xe7   :  { %3159 = vmatpush3.bf16.msra.mxu0 %v3668_v41  ;;  %v3694_v41 = vld [vmem:[%s4776_s3 + $0x108] sm:$0xff]  }
  0xe8   :  { %3160 = vmatprep.subr.bf16.mxu0 %v3670_v50  ;;  %3129 = vmatpush3.bf16.msra.mxu1 %v3687_v0 }
  0xe9   :  { %3130 = vmatprep.subr.bf16.mxu1 %v3689_v2 }
  0xea   :  { %3229 = vmatmul.mubr.bf16.gmra.mrb[36].mxu0 %v4437_v15  ;;  %v4638_v15 = vrot.slane %v4633_v12, %v289_v9 }
  0xeb   :  { %3161 = vmatpush3.bf16.msra.mxu0 %v3672_v54 }
  0xec   :  { %3162 = vmatprep.subr.bf16.mxu0 %v3674_v55  ;;  %3131 = vmatpush3.bf16.msra.mxu1 %v3691_v4 }
  0xed   :  { %3232 = vmatprep.subr.bf16.mxu1 %v4623_v6 }
  0xef   :  { %3163 = vmatpush3.bf16.msra.mxu0 %v3676_v56 }
  0xf0   :  { %3164 = vmatprep.subr.bf16.mxu0 %v3678_v57 }
  0xf3   :  { %3165 = vmatpush3.bf16.msra.mxu0 %v3680_v58 }
  0xf4   :  { %3166 = vmatprep.subr.bf16.mxu0 %v3682_v59 }
  0xf7   :  { %3167 = vmatpush3.bf16.msra.mxu0 %v3684_v61 }
  0xf8   :  { %3168 = vmatprep.subr.bf16.mxu0 %v3686_v63 }
  0xfb   :  { %3169 = vmatpush3.bf16.msra.mxu0 %v3688_v1 }
  0xfc   :  { %3170 = vmatprep.subr.bf16.mxu0 %v3690_v3  ;;  %v3695_v3 = vld [vmem:[%s4776_s3 + $0x110] sm:$0xff]  }
  0xff   :  { %3171 = vmatpush3.bf16.msra.mxu0 %v3692_v5 }
 0x175   :  { %v1636_v21 = vpop.f32.mrb[0].mxu0  ;;  %v1855_v22 = vpop.f32.mrb[0].mxu1 }
 0x176   :  { %v3256_v23 = vadd.f32 %v1636_v21, %v4638_v15  ;;  %v3272_v24 = vadd.f32 %v1855_v22, %v4641_v16  ;;  %v1638_v25 = vpop.f32.mrb[1].mxu0  ;;  %v1857_v26 = vpop.f32.mrb[1].mxu1 }
 0x177   :  { %v3257_v28 = vadd.f32 %v1638_v25, %v4644_v18  ;;  %v3273_v29 = vadd.f32 %v1857_v26, %v4647_v19  ;;  %v1640_v31 = vpop.f32.mrb[2].mxu0  ;;  %v1859_v32 = vpop.f32.mrb[2].mxu1 }
 0x178   :  { %v3258_v40 = vadd.f32 %v1640_v31, %v4638_v15  ;;  %v3274_v33 = vadd.f32 %v1859_v32, %v4641_v16  ;;  %v1642_v34 = vpop.f32.mrb[3].mxu0  ;;  %v1861_v10 = vpop.f32.mrb[3].mxu1  ;;  %v2089_v17 = vmax.f32 %v3256_v23, 0.0  ;;  %v2091_v38 = vmax.f32 %v3272_v24, 0.0 }
 0x179   :  { %v3259_v35 = vadd.f32 %v1642_v34, %v4644_v18  ;;  %v3275_v36 = vadd.f32 %v1861_v10, %v4647_v19  ;;  %v2090_v43 = vmax.f32 %v3257_v28, 0.0  ;;  %v2092_v20 = vmax.f32 %v3273_v29, 0.0  ;;  %v3696_v28 = vld [vmem:[%s4776_s3 + $0x118] sm:$0xff]  }
 0x17a   :  { %v2094_v39 = vmax.f32 %v3258_v40, 0.0  ;;  %v2096_v42 = vmax.f32 %v3274_v33, 0.0 }
 0x17b   :  { %v2095_v44 = vmax.f32 %v3259_v35, 0.0  ;;  %v2097_v45 = vmax.f32 %v3275_v36, 0.0 }
 0x17c   :  { %v2129_v27 = vpack.c.bf16 %v2094_v39, %v2089_v17  ;;  %v2131_v46 = vpack.c.bf16 %v2096_v42, %v2091_v38 }
 0x17d   :  { %v2130_v47 = vpack.c.bf16 %v2095_v44, %v2090_v43  ;;  %v2132_v30 = vpack.c.bf16 %v2097_v45, %v2092_v20  ;;  %v1646_v48 = vpop.f32.mrb[4].mxu0  ;;  %v1865_v49 = vpop.f32.mrb[4].mxu1  ;;  %v3697_v20 = vld [vmem:[%s4776_s3 + $0x120] sm:$0xff]  }
 0x17e   :  { %v3260_v37 = vadd.f32 %v1646_v48, %v4638_v15  ;;  %v3276_v51 = vadd.f32 %v1865_v49, %v4641_v16  ;;  %v1648_v52 = vpop.f32.mrb[5].mxu0  ;;  %v1867_v53 = vpop.f32.mrb[5].mxu1 }
 0x17f   :  { %v3261_v50 = vadd.f32 %v1648_v52, %v4644_v18  ;;  %v3277_v54 = vadd.f32 %v1867_v53, %v4647_v19  ;;  %v1650_v55 = vpop.f32.mrb[6].mxu0  ;;  %v1869_v56 = vpop.f32.mrb[6].mxu1  ;;  %2508 = vmatprep.mubr.bf16.mxu1 %v2130_v47  ;;  %2573 = vmatprep.mubr.bf16.mxu0 %v2132_v30 }
 0x180   :  { %v3262_v57 = vadd.f32 %v1650_v55, %v4638_v15  ;;  %v3278_v58 = vadd.f32 %v1869_v56, %v4641_v16  ;;  %v1652_v59 = vpop.f32.mrb[7].mxu0  ;;  %v1871_v60 = vpop.f32.mrb[7].mxu1  ;;  %2509 = vmatmul.mubr.bf16.vlgmr.msra.gmra.mrb[32].mxu1 %v2129_v27  ;;  %2574 = vmatmul.mubr.bf16.vlgmr.msra.gmra.mrb[40].mxu0 %v2131_v46  ;;  %v2099_v63 = vmax.f32 %v3260_v37, 0.0  ;;  %v2101_v0 = vmax.f32 %v3276_v51, 0.0 }
 0x181   :  { %v3263_v61 = vadd.f32 %v1652_v59, %v4644_v18  ;;  %v3279_v62 = vadd.f32 %v1871_v60, %v4647_v19  ;;  %3233 = vmatpush3.bf16.msra.mxu1 %v4623_v6  ;;  %v2100_v4 = vmax.f32 %v3261_v50, 0.0  ;;  %v2102_v5 = vmax.f32 %v3277_v54, 0.0  ;;  %v3698_v54 = vld [vmem:[%s4776_s3 + $0x128] sm:$0xff]  }
 0x182   :  { %v2104_v1 = vmax.f32 %v3262_v57, 0.0  ;;  %v2106_v2 = vmax.f32 %v3278_v58, 0.0  ;;  %3234 = vmatprep.subr.bf16.mxu1 %v3694_v41 }
 0x183   :  { %v2105_v7 = vmax.f32 %v3263_v61, 0.0  ;;  %v2107_v9 = vmax.f32 %v3279_v62, 0.0 }
 0x184   :  { %v2134_v11 = vpack.c.bf16 %v2104_v1, %v2099_v63  ;;  %v2136_v13 = vpack.c.bf16 %v2106_v2, %v2101_v0  ;;  %v305_v1 = vsub.s32 4, %v4626_v8 }
 0x185   :  { %v2135_v14 = vpack.c.bf16 %v2105_v7, %v2100_v4  ;;  %v2137_v21 = vpack.c.bf16 %v2107_v9, %v2102_v5  ;;  %v1656_v22 = vpop.f32.mrb[8].mxu0  ;;  %v1875_v23 = vpop.f32.mrb[8].mxu1  ;;  %3235 = vmatpush3.bf16.msra.mxu1 %v3694_v41 }
 0x186   :  { %v3264_v6 = vadd.f32 %v1656_v22, %v4638_v15  ;;  %v3280_v24 = vadd.f32 %v1875_v23, %v4641_v16  ;;  %v1658_v25 = vpop.f32.mrb[9].mxu0  ;;  %v1877_v26 = vpop.f32.mrb[9].mxu1  ;;  %3236 = vmatprep.subr.bf16.mxu1 %v3695_v3  ;;  %v4702_v8 = vrot.slane %v4633_v12, %v305_v1 }
 0x187   :  { %v3265_v29 = vadd.f32 %v1658_v25, %v4644_v18  ;;  %v3281_v31 = vadd.f32 %v1877_v26, %v4647_v19  ;;  %v1660_v32 = vpop.f32.mrb[10].mxu0  ;;  %v1879_v40 = vpop.f32.mrb[10].mxu1  ;;  %2516 = vmatprep.mubr.bf16.mxu1 %v2135_v14  ;;  %2581 = vmatprep.mubr.bf16.mxu0 %v2137_v21 }
 0x188   :  { %v3266_v33 = vadd.f32 %v1660_v32, %v4638_v15  ;;  %v3282_v34 = vadd.f32 %v1879_v40, %v4641_v16  ;;  %v1662_v10 = vpop.f32.mrb[11].mxu0  ;;  %v1881_v35 = vpop.f32.mrb[11].mxu1  ;;  %2517 = vmatmul.mubr.bf16.gmra.mrb[36].mxu1 %v2134_v11  ;;  %2582 = vmatmul.mubr.bf16.gmra.mrb[44].mxu0 %v2136_v13  ;;  %v2109_v38 = vmax.f32 %v3264_v6, 0.0  ;;  %v2111_v39 = vmax.f32 %v3280_v24, 0.0  ;;  %v3700_v24 = vld [vmem:[%s4776_s3 + $0x138] sm:$0xff]  }
 0x189   :  { %v3267_v36 = vadd.f32 %v1662_v10, %v4644_v18  ;;  %v3283_v17 = vadd.f32 %v1881_v35, %v4647_v19  ;;  %3237 = vmatpush3.bf16.msra.mxu1 %v3695_v3  ;;  %v2110_v44 = vmax.f32 %v3265_v29, 0.0  ;;  %v2112_v45 = vmax.f32 %v3281_v31, 0.0 }
 0x18a   :  { %v2114_v42 = vmax.f32 %v3266_v33, 0.0  ;;  %v2116_v43 = vmax.f32 %v3282_v34, 0.0  ;;  %3238 = vmatprep.subr.bf16.mxu1 %v3696_v28 }
 0x18b   :  { %v2115_v27 = vmax.f32 %v3267_v36, 0.0  ;;  %v2117_v46 = vmax.f32 %v3283_v17, 0.0 }
 0x18c   :  { %v2139_v47 = vpack.c.bf16 %v2114_v42, %v2109_v38  ;;  %v2141_v30 = vpack.c.bf16 %v2116_v43, %v2111_v39 }
 0x18d   :  { %v2140_v48 = vpack.c.bf16 %v2115_v27, %v2110_v44  ;;  %v2142_v49 = vpack.c.bf16 %v2117_v46, %v2112_v45  ;;  %v1666_v37 = vpop.f32.mrb[12].mxu0  ;;  %v1885_v51 = vpop.f32.mrb[12].mxu1  ;;  %3239 = vmatpush3.bf16.msra.mxu1 %v3696_v28 }
 0x18e   :  { %v3268_v52 = vadd.f32 %v1666_v37, %v4638_v15  ;;  %v3284_v53 = vadd.f32 %v1885_v51, %v4641_v16  ;;  %v1668_v41 = vpop.f32.mrb[13].mxu0  ;;  %v1887_v50 = vpop.f32.mrb[13].mxu1  ;;  %3240 = vmatprep.subr.bf16.mxu1 %v3697_v20 }
 0x18f   :  { %v3269_v55 = vadd.f32 %v1668_v41, %v4644_v18  ;;  %v3285_v56 = vadd.f32 %v1887_v50, %v4647_v19  ;;  %v1670_v57 = vpop.f32.mrb[14].mxu0  ;;  %v1889_v58 = vpop.f32.mrb[14].mxu1  ;;  %2524 = vmatprep.mubr.bf16.mxu1 %v2140_v48  ;;  %2589 = vmatprep.mubr.bf16.mxu0 %v2142_v49 }
 0x190   :  { %v3270_v59 = vadd.f32 %v1670_v57, %v4638_v15  ;;  %v3286_v60 = vadd.f32 %v1889_v58, %v4641_v16  ;;  %v1672_v61 = vpop.f32.mrb[15].mxu0  ;;  %v1891_v62 = vpop.f32.mrb[15].mxu1  ;;  %2525 = vmatmul.mubr.bf16.gmra.mrb[40].mxu1 %v2139_v47  ;;  %2590 = vmatmul.mubr.bf16.gmra.mrb[48].mxu0 %v2141_v30  ;;  %v2119_v2 = vmax.f32 %v3268_v52, 0.0  ;;  %v2121_v3 = vmax.f32 %v3284_v53, 0.0  ;;  %v3699_v15 = vld [vmem:[%s4776_s3 + $0x130] sm:$0xff]  }
 0x191   :  { %v3271_v63 = vadd.f32 %v1672_v61, %v4644_v18  ;;  %v3287_v0 = vadd.f32 %v1891_v62, %v4647_v19  ;;  %3241 = vmatpush3.bf16.msra.mxu1 %v3697_v20  ;;  %v2120_v16 = vmax.f32 %v3269_v55, 0.0  ;;  %v2122_v7 = vmax.f32 %v3285_v56, 0.0 }
 0x192   :  { %v2124_v4 = vmax.f32 %v3270_v59, 0.0  ;;  %v2126_v5 = vmax.f32 %v3286_v60, 0.0  ;;  %3242 = vmatprep.subr.bf16.mxu1 %v3698_v54 }
 0x193   :  { %v2125_v9 = vmax.f32 %v3271_v63, 0.0  ;;  %v2127_v11 = vmax.f32 %v3287_v0, 0.0 }
 0x194   :  { %v2144_v13 = vpack.c.bf16 %v2124_v4, %v2119_v2  ;;  %v2146_v18 = vpack.c.bf16 %v2126_v5, %v2121_v3 }
 0x195   :  { %v2145_v14 = vpack.c.bf16 %v2125_v9, %v2120_v16  ;;  %v2147_v19 = vpack.c.bf16 %v2127_v11, %v2122_v7  ;;  %v3040_v21 = vpop.f32.mrb[16].mxu0  ;;  %v3080_v22 = vpop.f32.mrb[16].mxu1  ;;  %3243 = vmatpush3.bf16.msra.mxu1 %v3698_v54 }
 0x196   :  { %v3041_v23 = vpop.f32.mrb[17].mxu0  ;;  %v3081_v6 = vpop.f32.mrb[17].mxu1  ;;  %3244 = vmatprep.subr.bf16.mxu1 %v3699_v15 }
 0x197   :  { %v3042_v25 = vadd.f32 %v3041_v23, %v3040_v21  ;;  %v3043_v26 = vpop.f32.mrb[18].mxu0  ;;  %2532 = vmatprep.mubr.bf16.mxu1 %v2145_v14  ;;  %2597 = vmatprep.mubr.bf16.mxu0 %v2147_v19  ;;  %v3082_v28 = vadd.f32 %v3081_v6, %v3080_v22  ;;  %v3083_v29 = vpop.f32.mrb[18].mxu1 }
 0x198   :  { %v3044_v31 = vpop.f32.mrb[19].mxu0  ;;  %2533 = vmatmul.mubr.bf16.gmra.mrb[44].mxu1 %v2144_v13  ;;  %2598 = vmatmul.mubr.bf16.gmra.mrb[52].mxu0 %v2146_v18  ;;  %v3084_v12 = vpop.f32.mrb[19].mxu1 }
 0x199   :  { %v1929_v32 = vadd.f32 %v3042_v25, %v4702_v8  ;;  %v3045_v40 = vadd.f32 %v3044_v31, %v3043_v26  ;;  %v3085_v33 = vadd.f32 %v3084_v12, %v3083_v29  ;;  %3245 = vmatpush3.bf16.msra.mxu1 %v3699_v15 }
 0x19a   :  { %3246 = vmatprep.subr.bf16.mxu1 %v3700_v24 }
 0x19b   :  { %v1932_v34 = vadd.f32 %v3045_v40, %v4702_v8  ;;  %v1994_v10 = vadd.f32 %v3082_v28, %v1929_v32 }
 0x19d   :  { %v3046_v35 = vpop.f32.mrb[20].mxu0  ;;  %v3086_v36 = vpop.f32.mrb[20].mxu1  ;;  %v1997_v17 = vadd.f32 %v3085_v33, %v1932_v34  ;;  %3247 = vmatpush3.bf16.msra.mxu1 %v3700_v24 }
 0x19e   :  { %v3047_v38 = vpop.f32.mrb[21].mxu0  ;;  %v3087_v39 = vpop.f32.mrb[21].mxu1 }
 0x19f   :  { %v3048_v42 = vadd.f32 %v3047_v38, %v3046_v35  ;;  %v3049_v43 = vpop.f32.mrb[22].mxu0  ;;  %v3088_v20 = vadd.f32 %v3087_v39, %v3086_v36  ;;  %v3089_v44 = vpop.f32.mrb[22].mxu1 }
 0x1a0   :  { %v3050_v45 = vpop.f32.mrb[23].mxu0  ;;  %v3090_v27 = vpop.f32.mrb[23].mxu1 }
 0x1a1   :  { %v1937_v46 = vadd.f32 %v3048_v42, %v4702_v8  ;;  %v3051_v47 = vadd.f32 %v3050_v45, %v3049_v43  ;;  %v3091_v30 = vadd.f32 %v3090_v27, %v3089_v44 }
 0x1a3   :  { %v1940_v48 = vadd.f32 %v3051_v47, %v4702_v8  ;;  %v2002_v49 = vadd.f32 %v3088_v20, %v1937_v46 }
 0x1a5   :  { %v3052_v37 = vpop.f32.mrb[24].mxu0  ;;  %v3092_v51 = vpop.f32.mrb[24].mxu1  ;;  %v2005_v52 = vadd.f32 %v3091_v30, %v1940_v48 }
 0x1a6   :  { %v3053_v53 = vpop.f32.mrb[25].mxu0  ;;  %v3093_v41 = vpop.f32.mrb[25].mxu1 }
 0x1a7   :  { %v3054_v50 = vadd.f32 %v3053_v53, %v3052_v37  ;;  %v3055_v54 = vpop.f32.mrb[26].mxu0  ;;  %v3094_v55 = vadd.f32 %v3093_v41, %v3092_v51  ;;  %v3095_v56 = vpop.f32.mrb[26].mxu1 }
 0x1a8   :  { %v3056_v57 = vpop.f32.mrb[27].mxu0  ;;  %v3096_v58 = vpop.f32.mrb[27].mxu1 }
 0x1a9   :  { %v1945_v59 = vadd.f32 %v3054_v50, %v4702_v8  ;;  %v3057_v60 = vadd.f32 %v3056_v57, %v3055_v54  ;;  %v3097_v61 = vadd.f32 %v3096_v58, %v3095_v56 }
 0x1ab   :  { %v1948_v62 = vadd.f32 %v3057_v60, %v4702_v8  ;;  %v2010_v63 = vadd.f32 %v3094_v55, %v1945_v59 }
 0x1ad   :  { %v3058_v0 = vpop.f32.mrb[28].mxu0  ;;  %v3098_v1 = vpop.f32.mrb[28].mxu1  ;;  %v2013_v2 = vadd.f32 %v3097_v61, %v1948_v62 }
 0x1ae   :  { %v3059_v3 = vpop.f32.mrb[29].mxu0  ;;  %v3099_v4 = vpop.f32.mrb[29].mxu1 }
 0x1af   :  { %v3060_v5 = vadd.f32 %v3059_v3, %v3058_v0  ;;  %v3061_v15 = vpop.f32.mrb[30].mxu0  ;;  %v3100_v16 = vadd.f32 %v3099_v4, %v3098_v1  ;;  %v3101_v7 = vpop.f32.mrb[30].mxu1 }
 0x1b0   :  { %v3062_v9 = vpop.f32.mrb[31].mxu0  ;;  %v3102_v11 = vpop.f32.mrb[31].mxu1 }
 0x1b1   :  { %v1953_v13 = vadd.f32 %v3060_v5, %v4702_v8  ;;  %v3063_v18 = vadd.f32 %v3062_v9, %v3061_v15  ;;  %v3103_v14 = vadd.f32 %v3102_v11, %v3101_v7 }
 0x1b3   :  { %v1956_v19 = vadd.f32 %v3063_v18, %v4702_v8  ;;  %v2018_v21 = vadd.f32 %v3100_v16, %v1953_v13 }
 0x1b5   :  { %v3226_v22 = vpop.f32.mrb[32].mxu0  ;;  %v2021_v23 = vadd.f32 %v3103_v14, %v1956_v19 }
 0x1b6   :  { %v2067_v6 = vadd.f32 %v3226_v22, %v2002_v49  ;;  %v2058_v24 = vpop.f32.mrb[33].mxu0  ;;  %v2983_v49 = vld [vmem:[%s4778_s4] ss:$0 sm:$0xff] }
 0x1b7   :  { %v2059_v25 = vadd.f32 %v2058_v24, %v1994_v10  ;;  %v3227_v26 = vpop.f32.mrb[34].mxu0 }
 0x1b8   :  { %v2070_v28 = vadd.f32 %v3227_v26, %v2005_v52  ;;  %v2061_v29 = vpop.f32.mrb[35].mxu0  ;;  %v2103_v12 = vmax.f32 %v2067_v6, 0.0 }
 0x1b9   :  { %v2062_v31 = vadd.f32 %v2061_v29, %v1997_v17  ;;  %v2093_v40 = vmax.f32 %v2059_v25, 0.0 }
 0x1ba   :  { %v2108_v32 = vmax.f32 %v2070_v28, 0.0 }
 0x1bb   :  { %v2098_v33 = vmax.f32 %v2062_v31, 0.0 }
 0x1bc   :  { %v2138_v34 = vpack.c.bf16 %v2108_v32, %v2103_v12 }
 0x1bd   :  { %v2133_v35 = vpack.c.bf16 %v2098_v33, %v2093_v40  ;;  %v3230_v36 = vpop.f32.mrb[36].mxu0 }
 0x1be   :  { %v2083_v38 = vadd.f32 %v3230_v36, %v2018_v21  ;;  %v2074_v39 = vpop.f32.mrb[37].mxu0 }
 0x1bf   :  { %v2075_v8 = vadd.f32 %v2074_v39, %v2010_v63  ;;  %v3231_v42 = vpop.f32.mrb[38].mxu0  ;;  %3248 = vmatprep.mubr.bf16.mxu1 %v2133_v35 }
 0x1c0   :  { %v2086_v43 = vadd.f32 %v3231_v42, %v2021_v23  ;;  %v2077_v20 = vpop.f32.mrb[39].mxu0  ;;  %3249 = vmatmul.mubr.bf16.vlgmr.msra.gmra.mrb[48].mxu1 %v2138_v34  ;;  %v2123_v44 = vmax.f32 %v2083_v38, 0.0 }
 0x1c1   :  { %v2078_v10 = vadd.f32 %v2077_v20, %v2013_v2  ;;  %v2113_v27 = vmax.f32 %v2075_v8, 0.0 }
 0x1c2   :  { %v2128_v45 = vmax.f32 %v2086_v43, 0.0 }
 0x1c3   :  { %v2118_v17 = vmax.f32 %v2078_v10, 0.0 }
 0x1c4   :  { %v2148_v46 = vpack.c.bf16 %v2128_v45, %v2123_v44 }
 0x1c5   :  { %v2143_v47 = vpack.c.bf16 %v2118_v17, %v2113_v27 }
 0x1c7   :  { %3252 = vmatprep.mubr.bf16.mxu1 %v2143_v47 }
 0x1c8   :  { %3253 = vmatmul.mubr.bf16.gmra.mrb[52].mxu1 %v2148_v46 }
 0x253   :  { %v3132_v30 = vpop.f32.mrb[32].mxu1  ;;  %v3172_v48 = vpop.f32.mrb[40].mxu0 }
 0x254   :  { %v3133_v37 = vpop.f32.mrb[33].mxu1  ;;  %v3173_v51 = vpop.f32.mrb[41].mxu0 }
 0x255   :  { %v3134_v52 = vadd.f32 %v3133_v37, %v3132_v30  ;;  %v3174_v53 = vadd.f32 %v3173_v51, %v3172_v48  ;;  %v3135_v41 = vpop.f32.mrb[34].mxu1  ;;  %v3175_v50 = vpop.f32.mrb[42].mxu0 }
 0x256   :  { %v3136_v54 = vpop.f32.mrb[35].mxu1  ;;  %v3176_v55 = vpop.f32.mrb[43].mxu0 }
 0x257   :  { %v2511_v56 = vadd.f32 %v3134_v52, %v2983_v49  ;;  %v3137_v57 = vadd.f32 %v3136_v54, %v3135_v41  ;;  %v3177_v58 = vadd.f32 %v3176_v55, %v3175_v50 }
 0x259   :  { %v2514_v59 = vadd.f32 %v3137_v57, %v2983_v49  ;;  %v2576_v60 = vadd.f32 %v3174_v53, %v2511_v56 }
 0x25b   :  { %v3138_v61 = vpop.f32.mrb[36].mxu1  ;;  %v3178_v62 = vpop.f32.mrb[44].mxu0  ;;  %v2579_v63 = vadd.f32 %v3177_v58, %v2514_v59 }
 0x25c   :  { %v3139_v0 = vpop.f32.mrb[37].mxu1  ;;  %v3179_v1 = vpop.f32.mrb[45].mxu0 }
 0x25d   :  { %v3140_v2 = vadd.f32 %v3139_v0, %v3138_v61  ;;  %v3180_v3 = vadd.f32 %v3179_v1, %v3178_v62  ;;  %v3141_v4 = vpop.f32.mrb[38].mxu1  ;;  %v3181_v5 = vpop.f32.mrb[46].mxu0 }
 0x25e   :  { %v3142_v15 = vpop.f32.mrb[39].mxu1  ;;  %v3182_v16 = vpop.f32.mrb[47].mxu0 }
 0x25f   :  { %v2519_v7 = vadd.f32 %v3140_v2, %v2983_v49  ;;  %v3143_v9 = vadd.f32 %v3142_v15, %v3141_v4  ;;  %v3183_v11 = vadd.f32 %v3182_v16, %v3181_v5 }
 0x261   :  { %v2522_v13 = vadd.f32 %v3143_v9, %v2983_v49  ;;  %v2584_v18 = vadd.f32 %v3180_v3, %v2519_v7 }
 0x263   :  { %v3144_v14 = vpop.f32.mrb[40].mxu1  ;;  %v3184_v19 = vpop.f32.mrb[48].mxu0  ;;  %v2587_v21 = vadd.f32 %v3183_v11, %v2522_v13 }
 0x264   :  { %v3145_v22 = vpop.f32.mrb[41].mxu1  ;;  %v3185_v23 = vpop.f32.mrb[49].mxu0 }
 0x265   :  { %v3146_v6 = vadd.f32 %v3145_v22, %v3144_v14  ;;  %v3186_v24 = vadd.f32 %v3185_v23, %v3184_v19  ;;  %v3147_v25 = vpop.f32.mrb[42].mxu1  ;;  %v3187_v26 = vpop.f32.mrb[50].mxu0 }
 0x266   :  { %v3148_v28 = vpop.f32.mrb[43].mxu1  ;;  %v3188_v29 = vpop.f32.mrb[51].mxu0 }
 0x267   :  { %v2527_v31 = vadd.f32 %v3146_v6, %v2983_v49  ;;  %v3149_v12 = vadd.f32 %v3148_v28, %v3147_v25  ;;  %v3189_v32 = vadd.f32 %v3188_v29, %v3187_v26 }
 0x269   :  { %v2530_v40 = vadd.f32 %v3149_v12, %v2983_v49  ;;  %v2592_v33 = vadd.f32 %v3186_v24, %v2527_v31 }
 0x26b   :  { %v3150_v34 = vpop.f32.mrb[44].mxu1  ;;  %v3190_v35 = vpop.f32.mrb[52].mxu0  ;;  %v2595_v36 = vadd.f32 %v3189_v32, %v2530_v40 }
 0x26c   :  { %v3151_v38 = vpop.f32.mrb[45].mxu1  ;;  %v3191_v39 = vpop.f32.mrb[53].mxu0 }
 0x26d   :  { %v3152_v8 = vadd.f32 %v3151_v38, %v3150_v34  ;;  %v3192_v42 = vadd.f32 %v3191_v39, %v3190_v35  ;;  %v3153_v43 = vpop.f32.mrb[46].mxu1  ;;  %v3193_v20 = vpop.f32.mrb[54].mxu0 }
 0x26e   :  { %v3154_v10 = vpop.f32.mrb[47].mxu1  ;;  %v3194_v44 = vpop.f32.mrb[55].mxu0 }
 0x26f   :  { %v2535_v45 = vadd.f32 %v3152_v8, %v2983_v49  ;;  %v3155_v27 = vadd.f32 %v3154_v10, %v3153_v43  ;;  %v3195_v17 = vadd.f32 %v3194_v44, %v3193_v20 }
 0x271   :  { %v2538_v46 = vadd.f32 %v3155_v27, %v2983_v49  ;;  %v2600_v47 = vadd.f32 %v3192_v42, %v2535_v45 }
 0x273   :  { %v2603_v30 = vadd.f32 %v3195_v17, %v2538_v46 }
 0x293   :  { %v3250_v48 = vpop.f32.mrb[48].mxu1 }
 0x294   :  { %v2649_v37 = vadd.f32 %v3250_v48, %v2584_v18  ;;  %v2640_v51 = vpop.f32.mrb[49].mxu1 }
 0x295   :  { %v2641_v52 = vadd.f32 %v2640_v51, %v2576_v60  ;;  %v3251_v53 = vpop.f32.mrb[50].mxu1 }
 0x296   :  { %v2652_v41 = vadd.f32 %v3251_v53, %v2587_v21  ;;  %v2643_v50 = vpop.f32.mrb[51].mxu1  ;;  %2675 = vmax.xlane.f32.xlu1 %v2649_v37 }
 0x297   :  { %v2644_v54 = vadd.f32 %v2643_v50, %v2579_v63  ;;  %2671 = vmax.xlane.f32.xlu0 %v2641_v52 }
 0x29a   :  { %2677 = vmax.xlane.f32.xlu1 %v2652_v41 }
 0x29b   :  { %v3254_v55 = vpop.f32.mrb[52].mxu1  ;;  %2673 = vmax.xlane.f32.xlu0 %v2644_v54 }
 0x29c   :  { %v2665_v56 = vadd.f32 %v3254_v55, %v2600_v47  ;;  %v2656_v57 = vpop.f32.mrb[53].mxu1 }
 0x29d   :  { %v2657_v58 = vadd.f32 %v2656_v57, %v2592_v33  ;;  %v3255_v59 = vpop.f32.mrb[54].mxu1 }
 0x29e   :  { %v2668_v49 = vadd.f32 %v3255_v59, %v2603_v30  ;;  %v2659_v61 = vpop.f32.mrb[55].mxu1 }
 0x29f   :  { %v2660_v62 = vadd.f32 %v2659_v61, %v2595_v36  ;;  %2679 = vmax.xlane.f32.xlu0 %v2657_v58 }
 0x2a1   :  { %2681 = vmax.xlane.f32.xlu1 %v2660_v62 }
 0x2a3   :  { %2683 = vmax.xlane.f32.xlu0 %v2665_v56 }
 0x2a5   :  { %2685 = vmax.xlane.f32.xlu1 %v2668_v49 }
 0x323   :  { %v2676_v60 = vpop.xlane.xlu1 %2675 }
 0x324   :  { %v4718_v0 = vsub.f32 %v2649_v37, %v2676_v60  ;;  %v2672_v1 = vpop.xlane.xlu0 %2671 }
 0x325   :  { %v4720_v63 = vsub.f32 %v2641_v52, %v2672_v1 }
 0x326   :  { %v2699_v2 = vmul.f32 1.442695, %v4718_v0 }
 0x327   :  { %v2695_v3 = vmul.f32 1.442695, %v4720_v63  ;;  %v2678_v4 = vpop.xlane.xlu1 %2677 }
 0x328   :  { %3701 = vpow2.f32 %v2699_v2  ;;  %v4724_v5 = vsub.f32 %v2652_v41, %v2678_v4  ;;  %v2674_v15 = vpop.xlane.xlu0 %2673 }
 0x329   :  { %v4726_v16 = vsub.f32 %v2644_v54, %v2674_v15  ;;  %3703 = vpow2.f32 %v2695_v3 }
 0x32a   :  { %v2701_v7 = vmul.f32 1.442695, %v4724_v5 }
 0x32b   :  { %v2697_v9 = vmul.f32 1.442695, %v4726_v16 }
 0x32c   :  { %3705 = vpow2.f32 %v2701_v7  ;;  %v2680_v11 = vpop.xlane.xlu0 %2679 }
 0x32d   :  { %v4730_v13 = vsub.f32 %v2657_v58, %v2680_v11  ;;  %3707 = vpow2.f32 %v2697_v9 }
 0x32e   :  { %v2682_v18 = vpop.xlane.xlu1 %2681 }
 0x32f   :  { %v2703_v14 = vmul.f32 1.442695, %v4730_v13  ;;  %v4733_v19 = vsub.f32 %v2660_v62, %v2682_v18 }
 0x330   :  { %v2684_v21 = vpop.xlane.xlu0 %2683 }
 0x331   :  { %3709 = vpow2.f32 %v2703_v14  ;;  %v2705_v22 = vmul.f32 1.442695, %v4733_v19  ;;  %v4736_v23 = vsub.f32 %v2665_v56, %v2684_v21 }
 0x332   :  { %v3702_v6 = vpop.eup %3701  ;;  %v2686_v24 = vpop.xlane.xlu1 %2685 }
 0x333   :  { %3711 = vpow2.f32 %v2705_v22  ;;  %v2707_v25 = vmul.f32 1.442695, %v4736_v23  ;;  %v4739_v26 = vsub.f32 %v2668_v49, %v2686_v24  ;;  %2715 = vadd.xlane.f32.xlu0 %v3702_v6  ;;  %v3704_v28 = vpop.eup %3703 }
 0x335   :  { %3713 = vpow2.f32 %v2707_v25  ;;  %v2709_v29 = vmul.f32 1.442695, %v4739_v26 }
 0x336   :  { %v3706_v31 = vpop.eup %3705 }
 0x337   :  { %3715 = vpow2.f32 %v2709_v29  ;;  %2717 = vadd.xlane.f32.xlu1 %v3706_v31  ;;  %2711 = vadd.xlane.f32.xlu0 %v3704_v28  ;;  %v3708_v12 = vpop.eup %3707 }
 0x33b   :  { %v3710_v32 = vpop.eup %3709  ;;  %2713 = vadd.xlane.f32.xlu1 %v3708_v12 }
 0x33c   :  { %2719 = vadd.xlane.f32.xlu0 %v3710_v32 }
 0x33d   :  { %v3712_v40 = vpop.eup %3711 }
 0x33f   :  { %v3714_v33 = vpop.eup %3713  ;;  %2721 = vadd.xlane.f32.xlu1 %v3712_v40 }
 0x340   :  { %2723 = vadd.xlane.f32.xlu0 %v3714_v33 }
 0x341   :  { %v3716_v34 = vpop.eup %3715 }
 0x343   :  { %2725 = vadd.xlane.f32.xlu1 %v3716_v34 }
 0x3c0   :  { %v2716_v35 = vpop.xlane.xlu0 %2715 }
 0x3c1   :  { %3717 = vlog2.f32 %v2716_v35 }
 0x3c4   :  { %v2718_v36 = vpop.xlane.xlu1 %2717  ;;  %v2712_v38 = vpop.xlane.xlu0 %2711 }
 0x3c5   :  { %3719 = vlog2.f32 %v2718_v36 }
 0x3c6   :  { %3721 = vlog2.f32 %v2712_v38 }
 0x3c8   :  { %v2714_v39 = vpop.xlane.xlu1 %2713 }
 0x3c9   :  { %3723 = vlog2.f32 %v2714_v39  ;;  %v2720_v8 = vpop.xlane.xlu0 %2719 }
 0x3ca   :  { %3725 = vlog2.f32 %v2720_v8 }
 0x3cb   :  { %v3718_v42 = vpop.eup %3717 }
 0x3cc   :  { %v2732_v43 = vmul.f32 0.6931472, %v3718_v42  ;;  %v2722_v20 = vpop.xlane.xlu1 %2721 }
 0x3cd   :  { %3727 = vlog2.f32 %v2722_v20  ;;  %v2724_v10 = vpop.xlane.xlu0 %2723 }
 0x3ce   :  { %v2745_v44 = vsub.f32 %v4718_v0, %v2732_v43  ;;  %3729 = vlog2.f32 %v2724_v10 }
 0x3cf   :  { %v3720_v45 = vpop.eup %3719 }
 0x3d0   :  { %v3722_v27 = vpop.eup %3721  ;;  %2753 = vst [vmem:[%s4779_s5 + $0x10] sm:$0xff] %v2745_v44  ;;  %v2734_v17 = vmul.f32 0.6931472, %v3720_v45  ;;  %v2726_v46 = vpop.xlane.xlu1 %2725 }
 0x3d1   :  { %v2728_v47 = vmul.f32 0.6931472, %v3722_v27  ;;  %3731 = vlog2.f32 %v2726_v46 }
 0x3d2   :  { %v2746_v30 = vsub.f32 %v4724_v5, %v2734_v17 }
 0x3d3   :  { %v3724_v48 = vpop.eup %3723  ;;  %v2743_v37 = vsub.f32 %v4720_v63, %v2728_v47 }
 0x3d4   :  { %v3726_v51 = vpop.eup %3725  ;;  %2754 = vst [vmem:[%s4779_s5 + $0x18] sm:$0xff] %v2746_v30  ;;  %v2730_v52 = vmul.f32 0.6931472, %v3724_v48 }
 0x3d5   :  { %2751 = vst [vmem:[%s4779_s5] sm:$0xff] %v2743_v37  ;;  %v2736_v53 = vmul.f32 0.6931472, %v3726_v51 }
 0x3d6   :  { %v2744_v41 = vsub.f32 %v4726_v16, %v2730_v52 }
 0x3d7   :  { %v3728_v50 = vpop.eup %3727  ;;  %v2747_v54 = vsub.f32 %v4730_v13, %v2736_v53 }
 0x3d8   :  { %v3730_v55 = vpop.eup %3729  ;;  %2752 = vst [vmem:[%s4779_s5 + $0x8] sm:$0xff] %v2744_v41  ;;  %v2738_v56 = vmul.f32 0.6931472, %v3728_v50 }
 0x3d9   :  { %2755 = vst [vmem:[%s4779_s5 + $0x20] sm:$0xff] %v2747_v54  ;;  %v2740_v57 = vmul.f32 0.6931472, %v3730_v55 }
 0x3da   :  { %v2748_v58 = vsub.f32 %v4733_v19, %v2738_v56 }
 0x3db   :  { %v3732_v59 = vpop.eup %3731  ;;  %v2749_v49 = vsub.f32 %v4736_v23, %v2740_v57 }
 0x3dc   :  { %2756 = vst [vmem:[%s4779_s5 + $0x28] sm:$0xff] %v2748_v58  ;;  %v2742_v61 = vmul.f32 0.6931472, %v3732_v59 }
 0x3dd   :  { %2757 = vst [vmem:[%s4779_s5 + $0x30] sm:$0xff] %v2749_v49 }
 0x3de   :  { %v2750_v62 = vsub.f32 %v4739_v26, %v2742_v61 }
 0x3e0   :  { %2758 = vst [vmem:[%s4779_s5 + $0x38] sm:$0xff] %v2750_v62 }

</bundles_post_ra>
